<compile_context>
chip_gen: v6e
topology: v6e:2x2x1
jax: 0.10.0
libtpu: 0.0.40
codegen_flags: <defaults>
</compile_context>

<pallas_src>
import math

import jax
import jax.numpy as jnp
from jax import lax
from jax.experimental import pallas as pl
from jax.experimental.pallas import tpu as pltpu


# ------------------------- shared helpers -------------------------

def _layer_norm(h, gamma, beta, eps=1e-5):
    h = h.astype(jnp.float32)
    mean = jnp.mean(h, axis=-1, keepdims=True)
    var = jnp.mean(jnp.square(h - mean), axis=-1, keepdims=True)
    return (h - mean) * lax.rsqrt(var + eps) * gamma.astype(jnp.float32) + beta.astype(jnp.float32)


def _pick_tile(n, preferred, align):
    """Largest tile <= preferred that divides n and is a multiple of `align`;
    falls back to the full dimension (always a legal block size)."""
    if n <= preferred:
        return n
    t = (preferred // align) * align
    while t >= align:
        if n % t == 0:
            return t
        t -= align
    return n


def _default_vmem_limit():
    """Generation-aware VMEM budget: ~3/4 of physical per-core VMEM, capped at 100 MiB.
    v7x (64 MiB) -> 48 MiB; v5e/v6e (128 MiB) -> 96-100 MiB."""
    try:
        cap = int(pltpu.get_tpu_info().vmem_capacity_bytes)
        return max(32 * 1024 * 1024, min((cap * 3) // 4, 100 * 1024 * 1024))
    except Exception:
        return 64 * 1024 * 1024


# ------------------------- stage 1: LN1 + QKV + RoPE (head layout out) -------------------------

def _qkv_rope_kernel(x_ref, cos_ref, sin_s_ref, g1_ref, b1_ref,
                     wq_ref, bq_ref, wk_ref, bk_ref, wv_ref, bv_ref,
                     h_ref, qh_ref, kh_ref, vh_ref, kc_ref, vc_ref):
    x = x_ref[0]                                    # (Ts, C)
    Ts, C = x.shape
    H = qh_ref.shape[1]
    Dh = qh_ref.shape[3]
    half = C // 2
    scale = 1.0 / math.sqrt(Dh)                     # folded into q once, here

    h = _layer_norm(x, g1_ref[...], b1_ref[...])    # (Ts, C) f32
    h_ref[0] = h.astype(h_ref.dtype)

    hm = h.astype(wq_ref.dtype)                     # MXU operand dtype follows the weights
    q = jnp.dot(hm, wq_ref[...], preferred_element_type=jnp.float32) + bq_ref[...]
    k = jnp.dot(hm, wk_ref[...], preferred_element_type=jnp.float32) + bk_ref[...]
    v = jnp.dot(hm, wv_ref[...], preferred_element_type=jnp.float32) + bv_ref[...]

    # kv_cache_new holds *pre-RoPE* k and v (the reference rebinds k after caching).
    kc_ref[0] = k.astype(kc_ref.dtype)
    vc_ref[0] = v.astype(vc_ref.dtype)

    # RoPE rotate-half.  sin_s is pre-sign-flipped on the first half (computed once in the
    # wrapper), so:  t*cos + cat([t[:,half:], t[:,:half]])*sin_s == t*cos + neg_half*sin.
    cos = cos_ref[...].astype(jnp.float32)
    sin_s = sin_s_ref[...].astype(jnp.float32)

    def rope(t):
        rot = jnp.concatenate([t[:, half:], t[:, :half]], axis=-1)
        return t * cos + rot * sin_s

    q_r = rope(q) * scale                           # 1/sqrt(Dh) folded in; q is not returned
    k_r = rope(k)

    # Emit q/k/v directly in (1, H, Ts, Dh) head layout so stage 2 needs no XLA
    # reshape/transpose between the pallas_calls (saves 3 full-tensor HBM round trips).
    for hh in range(H):
        sl = slice(hh * Dh, (hh + 1) * Dh)
        qh_ref[0, hh] = q_r[:, sl].astype(qh_ref.dtype)
        kh_ref[0, hh] = k_r[:, sl].astype(kh_ref.dtype)
        vh_ref[0, hh] = v[:, sl].astype(vh_ref.dtype)


# ------------------------- stage 2: triangular flash attention + out-proj + residual -------------------------

def _flash_attn_kernel(i_tab_ref, j_tab_ref,
                       h_ref, q_ref, k_ref, v_ref, wo_ref, bo_ref, out_ref,
                       m_scr, l_scr, acc_scr, cat_scr):
    # Grid axis 1 enumerates only lower-triangular (i, j) tile pairs (j <= i), so every
    # visited step does useful work and no fully-masked kv block is ever DMA'd.
    p = pl.program_id(1)
    i = i_tab_ref[p]                  # q-tile row index
    j = j_tab_ref[p]                  # kv-tile column index (0 .. i)
    H = q_ref.shape[1]
    Tq = q_ref.shape[2]
    Dh = q_ref.shape[3]
    Tk = k_ref.shape[2]

    @pl.when(j == 0)
    def _init():
        m_scr[...] = jnp.full(m_scr.shape, -1e30, dtype=m_scr.dtype)
        l_scr[...] = jnp.zeros(l_scr.shape, dtype=l_scr.dtype)
        acc_scr[...] = jnp.zeros(acc_scr.shape, dtype=acc_scr.dtype)

    q = q_ref[0]                                            # (H, Tq, Dh), already scaled
    k = k_ref[0]                                            # (H, Tk, Dh)
    v = v_ref[0]                                            # (H, Tk, Dh)
    s = jnp.einsum("hqd,hkd->hqk", q, k, preferred_element_type=jnp.float32)
    rows = i * Tq + lax.broadcasted_iota(jnp.int32, (Tq, Tk), 0)
    cols = j * Tk + lax.broadcasted_iota(jnp.int32, (Tq, Tk), 1)
    s = jnp.where((cols <= rows)[None, :, :], s, -1e30)     # finite => no inf-inf NaN

    m_prev = m_scr[...]
    m_new = jnp.maximum(m_prev, jnp.max(s, axis=-1, keepdims=True))
    alpha = jnp.exp(m_prev - m_new)
    pmat = jnp.exp(s - m_new)
    l_scr[...] = alpha * l_scr[...] + jnp.sum(pmat, axis=-1, keepdims=True)
    acc_scr[...] = alpha * acc_scr[...] + jnp.einsum(
        "hqk,hkd->hqd", pmat.astype(v.dtype), v, preferred_element_type=jnp.float32)
    m_scr[...] = m_new

    # The diagonal tile (j == i, Tq == Tk) is the last kv tile of this q row: finalize here
    # instead of idling through the rest of a rectangular kv axis.
    @pl.when(j == i)
    def _finalize():
        inv_l = 1.0 / l_scr[...]                            # exact divide, once per q row
        attn = acc_scr[...] * inv_l                         # (H, Tq, Dh)
        # Relayout (H, Tq, Dh) -> (Tq, H*Dh = C) with static lane-slice stores, then ONE
        # full-depth (K=C) output projection on the MXU (replaces H tiny K=Dh matmuls).
        for hh in range(H):
            cat_scr[:, hh * Dh:(hh + 1) * Dh] = attn[hh]
        proj = jnp.dot(cat_scr[...].astype(wo_ref.dtype), wo_ref[...],
                       preferred_element_type=jnp.float32) + bo_ref[...]
        # Residual adds onto the *post-LN1* activations (reference rebinds x).
        out_ref[0] = (h_ref[0].astype(jnp.float32) + proj).astype(out_ref.dtype)


# ------------------------- stage 3: LN2 + MLP (hidden-dim streamed) + residual -------------------------

def _mlp_kernel(x2_ref, g2_ref, be2_ref, w1_ref, b1_ref, w2_ref, b2_ref, y_ref,
                h3_scr, acc_scr):
    hj = pl.program_id(2)

    @pl.when(hj == 0)
    def _init():
        h3_scr[...] = _layer_norm(x2_ref[0], g2_ref[...], be2_ref[...]).astype(h3_scr.dtype)
        acc_scr[...] = jnp.zeros(acc_scr.shape, dtype=acc_scr.dtype)

    h3 = h3_scr[...]
    m1 = jnp.dot(h3.astype(w1_ref.dtype), w1_ref[...],
                 preferred_element_type=jnp.float32) + b1_ref[...]
    # Exact (erf) GELU to match torch.nn.GELU() default numerics.
    g = 0.5 * m1 * (1.0 + lax.erf(m1 * (1.0 / math.sqrt(2.0))))
    acc_scr[...] += jnp.dot(g.astype(w2_ref.dtype), w2_ref[...],
                            preferred_element_type=jnp.float32)

    @pl.when(hj == pl.num_programs(2) - 1)
    def _finalize():
        # Residual adds onto the *post-LN2* activations (reference rebinds x).
        y_ref[0] = (h3_scr[...] + acc_scr[...] + b2_ref[...]).astype(y_ref.dtype)


# ------------------------- wrapper -------------------------

def attention_block(x, params, cos, sin, *, n_heads,
                    seq_tile=256, attn_tile=256, hidden_tile=512,
                    vmem_limit_bytes=None):
    B, T, C = x.shape
    H = n_heads
    assert C % H == 0
    Dh = C // H
    H4 = 4 * C
    dt = x.dtype

    if vmem_limit_bytes is None:
        vmem_limit_bytes = _default_vmem_limit()

    # Align sequence tiles to the packed-sublane size of the activation dtype.
    seq_align = 8 if jnp.dtype(dt).itemsize >= 4 else 16
    Ts = _pick_tile(T, seq_tile, seq_align)          # stage 1 / 3 sequence tile
    Tc = _pick_tile(T, attn_tile, seq_align)         # attention tile (q tile == kv tile)
    Hc = _pick_tile(H4, hidden_tile, 128)            # streamed MLP hidden chunk

    def cparams(sem):
        return pltpu.CompilerParams(dimension_semantics=sem,
                                    vmem_limit_bytes=vmem_limit_bytes)

    # Pre-fold the rotate-half sign into sin once (constant VPU work hoisted out of stage 1).
    half = C // 2
    sin_s = jnp.concatenate([-sin[:, :half], sin[:, half:]], axis=-1)

    # ---- stage 1: LN1 + QKV projections + RoPE, emitting head layout ----
    c1 = lambda shape: pl.BlockSpec(shape, lambda b, s: (0,) * len(shape))
    flat = jax.ShapeDtypeStruct((B, T, C), dt)
    headed = jax.ShapeDtypeStruct((B, H, T, Dh), dt)
    stage1 = pl.pallas_call(
        _qkv_rope_kernel,
        out_shape=(flat, headed, headed, headed, flat, flat),
        grid_spec=pltpu.PrefetchScalarGridSpec(
            num_scalar_prefetch=0,
            grid=(B, T // Ts),
            in_specs=[
                pl.BlockSpec((1, Ts, C), lambda b, s: (b, s, 0)),   # x
                pl.BlockSpec((Ts, C), lambda b, s: (s, 0)),         # cos
                pl.BlockSpec((Ts, C), lambda b, s: (s, 0)),         # sin (pre-sign-flipped)
                c1((1, C)), c1((1, C)),                             # ln1 gamma / beta
                c1((C, C)), c1((1, C)),                             # wq, bq
                c1((C, C)), c1((1, C)),                             # wk, bk
                c1((C, C)), c1((1, C)),                             # wv, bv
            ],
            out_specs=(
                pl.BlockSpec((1, Ts, C), lambda b, s: (b, s, 0)),         # h (post-LN1)
                pl.BlockSpec((1, H, Ts, Dh), lambda b, s: (b, 0, s, 0)),  # q heads (RoPE, scaled)
                pl.BlockSpec((1, H, Ts, Dh), lambda b, s: (b, 0, s, 0)),  # k heads (RoPE)
                pl.BlockSpec((1, H, Ts, Dh), lambda b, s: (b, 0, s, 0)),  # v heads
                pl.BlockSpec((1, Ts, C), lambda b, s: (b, s, 0)),         # k cache (pre-RoPE)
                pl.BlockSpec((1, Ts, C), lambda b, s: (b, s, 0)),         # v cache
            ),
        ),
        compiler_params=cparams(("parallel", "parallel")),
    )
    h, qh, kh, vh, k_pre, v_pre = stage1(
        x, cos, sin_s, params["ln1g"], params["ln1b"],
        params["wq"], params["bq"], params["wk"], params["bk"],
        params["wv"], params["bv"])

    # ---- stage 2: causal flash attention over a triangular (i, j) pair grid ----
    nq = T // Tc
    pairs_i, pairs_j = [], []
    for qi in range(nq):
        for kj in range(qi + 1):                   # only the causal lower triangle
            pairs_i.append(qi)
            pairs_j.append(kj)
    i_tab = jnp.asarray(pairs_i, dtype=jnp.int32)
    j_tab = jnp.asarray(pairs_j, dtype=jnp.int32)
    n_pairs = len(pairs_i)

    stage2 = pl.pallas_call(
        _flash_attn_kernel,
        out_shape=jax.ShapeDtypeStruct((B, T, C), dt),
        grid_spec=pltpu.PrefetchScalarGridSpec(
            num_scalar_prefetch=2,                 # i_tab, j_tab prefetched into SMEM
            grid=(B, n_pairs),
            in_specs=[
                pl.BlockSpec((1, Tc, C), lambda b, p, it, jt: (b, it[p], 0)),         # h (residual)
                pl.BlockSpec((1, H, Tc, Dh), lambda b, p, it, jt: (b, 0, it[p], 0)),  # q heads
                pl.BlockSpec((1, H, Tc, Dh), lambda b, p, it, jt: (b, 0, jt[p], 0)),  # k heads
                pl.BlockSpec((1, H, Tc, Dh), lambda b, p, it, jt: (b, 0, jt[p], 0)),  # v heads
                pl.BlockSpec((C, C), lambda b, p, it, jt: (0, 0)),                    # wo
                pl.BlockSpec((1, C), lambda b, p, it, jt: (0, 0)),                    # bo
            ],
            out_specs=pl.BlockSpec((1, Tc, C), lambda b, p, it, jt: (b, it[p], 0)),
            scratch_shapes=[
                pltpu.VMEM((H, Tc, 1), jnp.float32),    # running max
                pltpu.VMEM((H, Tc, 1), jnp.float32),    # running sum
                pltpu.VMEM((H, Tc, Dh), jnp.float32),   # per-head output accumulator
                pltpu.VMEM((Tc, C), jnp.float32),       # (Tq, C) relayout buffer for out-proj
            ],
        ),
        compiler_params=cparams(("parallel", "arbitrary")),
    )
    x2 = stage2(i_tab, j_tab, h, qh, kh, vh, params["wo"], params["bo"])

    # ---- stage 3: LN2 + MLP with the 4C hidden dim as a streamed reduction axis ----
    stage3 = pl.pallas_call(
        _mlp_kernel,
        out_shape=jax.ShapeDtypeStruct((B, T, C), dt),
        grid_spec=pltpu.PrefetchScalarGridSpec(
            num_scalar_prefetch=0,
            grid=(B, T // Ts, H4 // Hc),
            in_specs=[
                pl.BlockSpec((1, Ts, C), lambda b, s, j: (b, s, 0)),   # x2
                pl.BlockSpec((1, C), lambda b, s, j: (0, 0)),          # ln2 gamma
                pl.BlockSpec((1, C), lambda b, s, j: (0, 0)),          # ln2 beta
                pl.BlockSpec((C, Hc), lambda b, s, j: (0, j)),         # w1 column block
                pl.BlockSpec((1, Hc), lambda b, s, j: (0, j)),         # b1 block
                pl.BlockSpec((Hc, C), lambda b, s, j: (j, 0)),         # w2 row block
                pl.BlockSpec((1, C), lambda b, s, j: (0, 0)),          # b2
            ],
            out_specs=pl.BlockSpec((1, Ts, C), lambda b, s, j: (b, s, 0)),
            scratch_shapes=[
                pltpu.VMEM((Ts, C), jnp.float32),   # post-LN2 activations (resident)
                pltpu.VMEM((Ts, C), jnp.float32),   # MLP accumulator
            ],
        ),
        compiler_params=cparams(("parallel", "parallel", "arbitrary")),
    )
    y = stage3(x2, params["ln2g"], params["ln2b"],
               params["w1"], params["b1"], params["w2"], params["b2"])

    # kv_cache_new = [k, v] with pre-RoPE k (PyTorch reference semantics).
    return y, k_pre, v_pre


# ------------------------- pure-JAX reference (for verification) -------------------------

def reference(x, p, cos, sin, n_heads):
    def ln(h, g, b):
        mu = h.mean(-1, keepdims=True)
        var = ((h - mu) ** 2).mean(-1, keepdims=True)
        return (h - mu) / jnp.sqrt(var + 1e-5) * g + b

    B, T, C = x.shape
    Dh = C // n_heads
    h = ln(x, p["ln1g"], p["ln1b"])
    q = h @ p["wq"] + p["bq"]
    k = h @ p["wk"] + p["bk"]
    v = h @ p["wv"] + p["bv"]
    kc, vc = k, v

    def rope(t):
        nh = jnp.concatenate([-t[..., C // 2:], t[..., :C // 2]], -1)
        return t * cos + nh * sin

    q, k = rope(q), rope(k)
    qh = q.reshape(B, T, n_heads, Dh).transpose(0, 2, 1, 3)
    kh = k.reshape(B, T, n_heads, Dh).transpose(0, 2, 1, 3)
    vh = v.reshape(B, T, n_heads, Dh).transpose(0, 2, 1, 3)
    s = qh @ kh.transpose(0, 1, 3, 2) / math.sqrt(Dh)
    mask = jnp.tril(jnp.ones((T, T)))
    s = jnp.where(mask == 0, -jnp.inf, s)
    a = jax.nn.softmax(s, axis=-1)
    o = (a @ vh).transpose(0, 2, 1, 3).reshape(B, T, C)
    attn = o @ p["wo"] + p["bo"]
    h2 = h + attn
    h3 = ln(h2, p["ln2g"], p["ln2b"])
    m = jax.nn.gelu(h3 @ p["w1"] + p["b1"], approximate=False)
    y = h3 + (m @ p["w2"] + p["b2"])
    return y, kc, vc


# ------------------------- main -------------------------

if __name__ == "__main__":
    # Small but TPU-friendly demo config (lane-dense C, multi-tile T so the triangular
    # flash / streamed-MLP code paths are exercised): B=2, T=32, C=256, 4 heads (Dh=64).
    B, T, C, H = 2, 32, 256, 4
    key = jax.random.PRNGKey(0)
    keys = jax.random.split(key, 16)

    def w(k, shape, scale=0.1):
        return (scale * jax.random.normal(k, shape)).astype(jnp.float32)

    params = {
        "ln1g": 1.0 + w(keys[0], (1, C), 0.05),
        "ln1b": w(keys[1], (1, C), 0.05),
        "wq": w(keys[2], (C, C)), "bq": w(keys[3], (1, C), 0.02),
        "wk": w(keys[4], (C, C)), "bk": w(keys[5], (1, C), 0.02),
        "wv": w(keys[6], (C, C)), "bv": w(keys[7], (1, C), 0.02),
        "wo": w(keys[8], (C, C)), "bo": w(keys[9], (1, C), 0.02),
        "ln2g": 1.0 + w(keys[10], (1, C), 0.05),
        "ln2b": w(keys[11], (1, C), 0.05),
        "w1": w(keys[12], (C, 4 * C)), "b1": w(keys[13], (1, 4 * C), 0.02),
        "w2": w(keys[14], (4 * C, C)), "b2": w(keys[15], (1, C), 0.02),
    }

    # RoPE cache: cos/sin of shape (T, C).
    pos = jnp.arange(T, dtype=jnp.float32)[:, None]
    inv_freq = 1.0 / (10000.0 ** (jnp.arange(0, C // 2, dtype=jnp.float32) / (C // 2)))
    angles = pos * inv_freq[None, :]
    cos = jnp.concatenate([jnp.cos(angles), jnp.cos(angles)], axis=-1)
    sin = jnp.concatenate([jnp.sin(angles), jnp.sin(angles)], axis=-1)

    x = jax.random.normal(jax.random.PRNGKey(42), (B, T, C), dtype=jnp.float32)

    # Small tiles here purely to exercise the multi-tile triangular flash grid and the
    # hidden-dim reduction at this tiny T; production defaults are the MXU-wide 256/512.
    y, k_new, v_new = attention_block(x, params, cos, sin, n_heads=H,
                                      seq_tile=16, attn_tile=16, hidden_tile=512)
    jax.block_until_ready((y, k_new, v_new))

    y_ref, kc_ref, vc_ref = reference(x, params, cos, sin, H)
    assert jnp.allclose(y, y_ref, rtol=1e-3, atol=1e-3), "output mismatch"
    assert jnp.allclose(k_new, kc_ref, rtol=1e-3, atol=1e-3), "k cache mismatch"
    assert jnp.allclose(v_new, vc_ref, rtol=1e-3, atol=1e-3), "v cache mismatch"

    print("KERNEL_OK")
</pallas_src>

<mosaic_0001>
module attributes {stable_mosaic.version = 11 : i64} {
  func.func @_qkv_rope_kernel(%arg0: i32, %arg1: i32, %arg2: memref<1x16x256xf32, #tpu.memory_space<vmem>>, %arg3: memref<16x256xf32, #tpu.memory_space<vmem>>, %arg4: memref<16x256xf32, #tpu.memory_space<vmem>>, %arg5: memref<1x256xf32, #tpu.memory_space<vmem>>, %arg6: memref<1x256xf32, #tpu.memory_space<vmem>>, %arg7: memref<256x256xf32, #tpu.memory_space<vmem>>, %arg8: memref<1x256xf32, #tpu.memory_space<vmem>>, %arg9: memref<256x256xf32, #tpu.memory_space<vmem>>, %arg10: memref<1x256xf32, #tpu.memory_space<vmem>>, %arg11: memref<256x256xf32, #tpu.memory_space<vmem>>, %arg12: memref<1x256xf32, #tpu.memory_space<vmem>>, %arg13: memref<1x16x256xf32, #tpu.memory_space<vmem>>, %arg14: memref<1x4x16x64xf32, #tpu.memory_space<vmem>>, %arg15: memref<1x4x16x64xf32, #tpu.memory_space<vmem>>, %arg16: memref<1x4x16x64xf32, #tpu.memory_space<vmem>>, %arg17: memref<1x16x256xf32, #tpu.memory_space<vmem>>, %arg18: memref<1x16x256xf32, #tpu.memory_space<vmem>>) attributes {dimension_semantics = [#tpu.dimension_semantics<parallel>, #tpu.dimension_semantics<parallel>], iteration_bounds = array<i64: 2, 2>, scalar_prefetch = 0 : i64, scratch_operands = 0 : i64, tpu.core_type = #tpu.core_type<tc>, window_params = [{transform_indices = @transform_0, window_bounds = array<i64: 1, 16, 256>}, {transform_indices = @transform_1, window_bounds = array<i64: 16, 256>}, {transform_indices = @transform_2, window_bounds = array<i64: 16, 256>}, {pipeline_mode = #tpu.pipeline_mode<synchronous>, transform_indices = @transform_3, window_bounds = array<i64: 1, 256>}, {pipeline_mode = #tpu.pipeline_mode<synchronous>, transform_indices = @transform_4, window_bounds = array<i64: 1, 256>}, {pipeline_mode = #tpu.pipeline_mode<synchronous>, transform_indices = @transform_5, window_bounds = array<i64: 256, 256>}, {pipeline_mode = #tpu.pipeline_mode<synchronous>, transform_indices = @transform_6, window_bounds = array<i64: 1, 256>}, {pipeline_mode = #tpu.pipeline_mode<synchronous>, transform_indices = @transform_7, window_bounds = array<i64: 256, 256>}, {pipeline_mode = #tpu.pipeline_mode<synchronous>, transform_indices = @transform_8, window_bounds = array<i64: 1, 256>}, {pipeline_mode = #tpu.pipeline_mode<synchronous>, transform_indices = @transform_9, window_bounds = array<i64: 256, 256>}, {pipeline_mode = #tpu.pipeline_mode<synchronous>, transform_indices = @transform_10, window_bounds = array<i64: 1, 256>}, {transform_indices = @transform_11, window_bounds = array<i64: 1, 16, 256>}, {transform_indices = @transform_12, window_bounds = array<i64: 1, 4, 16, 64>}, {transform_indices = @transform_13, window_bounds = array<i64: 1, 4, 16, 64>}, {transform_indices = @transform_14, window_bounds = array<i64: 1, 4, 16, 64>}, {transform_indices = @transform_15, window_bounds = array<i64: 1, 16, 256>}, {transform_indices = @transform_16, window_bounds = array<i64: 1, 16, 256>}]} {
    %c0 = arith.constant 0 : index
    %c0_0 = arith.constant 0 : index
    %c0_1 = arith.constant 0 : index
    %0 = vector.load %arg2[%c0, %c0_0, %c0_1] : memref<1x16x256xf32, #tpu.memory_space<vmem>>, vector<1x16x256xf32>
    %1 = vector.shape_cast %0 : vector<1x16x256xf32> to vector<16x256xf32>
    %c0_2 = arith.constant 0 : index
    %c0_3 = arith.constant 0 : index
    %2 = vector.load %arg5[%c0_2, %c0_3] : memref<1x256xf32, #tpu.memory_space<vmem>>, vector<1x256xf32>
    %c0_4 = arith.constant 0 : index
    %c0_5 = arith.constant 0 : index
    %3 = vector.load %arg6[%c0_4, %c0_5] : memref<1x256xf32, #tpu.memory_space<vmem>>, vector<1x256xf32>
    %cst = arith.constant dense<0.000000e+00> : vector<16xf32>
    %4 = vector.multi_reduction <add>, %1, %cst [1] : vector<16x256xf32> to vector<16xf32>
    %5 = vector.shape_cast %4 : vector<16xf32> to vector<16x1xf32>
    %cst_6 = arith.constant 2.560000e+02 : f32
    %6 = vector.broadcast %cst_6 : f32 to vector<16x1xf32>
    %7 = arith.divf %5, %6 : vector<16x1xf32>
    %8 = vector.broadcast %7 : vector<16x1xf32> to vector<16x256xf32>
    %9 = arith.subf %1, %8 : vector<16x256xf32>
    %10 = arith.mulf %9, %9 : vector<16x256xf32>
    %cst_7 = arith.constant dense<0.000000e+00> : vector<16xf32>
    %11 = vector.multi_reduction <add>, %10, %cst_7 [1] : vector<16x256xf32> to vector<16xf32>
    %12 = vector.shape_cast %11 : vector<16xf32> to vector<16x1xf32>
    %cst_8 = arith.constant 2.560000e+02 : f32
    %13 = vector.broadcast %cst_8 : f32 to vector<16x1xf32>
    %14 = arith.divf %12, %13 : vector<16x1xf32>
    %15 = vector.broadcast %7 : vector<16x1xf32> to vector<16x256xf32>
    %16 = arith.subf %1, %15 : vector<16x256xf32>
    %cst_9 = arith.constant 9.99999974E-6 : f32
    %17 = vector.broadcast %cst_9 : f32 to vector<16x1xf32>
    %18 = arith.addf %14, %17 : vector<16x1xf32>
    %19 = math.rsqrt %18 : vector<16x1xf32>
    %20 = vector.broadcast %19 : vector<16x1xf32> to vector<16x256xf32>
    %21 = arith.mulf %16, %20 : vector<16x256xf32>
    %22 = vector.broadcast %2 : vector<1x256xf32> to vector<16x256xf32>
    %23 = arith.mulf %21, %22 : vector<16x256xf32>
    %24 = vector.broadcast %3 : vector<1x256xf32> to vector<16x256xf32>
    %25 = arith.addf %23, %24 : vector<16x256xf32>
    %c0_10 = arith.constant 0 : index
    %c0_11 = arith.constant 0 : index
    %c0_12 = arith.constant 0 : index
    %26 = vector.load %arg13[%c0_10, %c0_11, %c0_12] : memref<1x16x256xf32, #tpu.memory_space<vmem>>, vector<1x16x256xf32>
    %27 = vector.shape_cast %26 : vector<1x16x256xf32> to vector<16x256xf32>
    %28 = vector.shape_cast %25 : vector<16x256xf32> to vector<1x16x256xf32>
    tpu.vector_store %arg13[%c0_10, %c0_11, %c0_12], %28 {strides = array<i32>} : memref<1x16x256xf32, #tpu.memory_space<vmem>>, vector<1x16x256xf32>,
    %c0_13 = arith.constant 0 : index
    %c0_14 = arith.constant 0 : index
    %29 = vector.load %arg7[%c0_13, %c0_14] : memref<256x256xf32, #tpu.memory_space<vmem>>, vector<256x256xf32>
    %cst_15 = arith.constant dense<0.000000e+00> : vector<16x256xf32>
    %30 = tpu.matmul %25, %29, %cst_15 {dimension_numbers = #tpu.dot_dimension_numbers<[1], [0], [0], [1], [0, 0, 1, 1], [], []>} : vector<16x256xf32>, vector<256x256xf32>, vector<16x256xf32> -> vector<16x256xf32>
    %c0_16 = arith.constant 0 : index
    %c0_17 = arith.constant 0 : index
    %31 = vector.load %arg8[%c0_16, %c0_17] : memref<1x256xf32, #tpu.memory_space<vmem>>, vector<1x256xf32>
    %32 = vector.broadcast %31 : vector<1x256xf32> to vector<16x256xf32>
    %33 = arith.addf %30, %32 : vector<16x256xf32>
    %c0_18 = arith.constant 0 : index
    %c0_19 = arith.constant 0 : index
    %34 = vector.load %arg9[%c0_18, %c0_19] : memref<256x256xf32, #tpu.memory_space<vmem>>, vector<256x256xf32>
    %cst_20 = arith.constant dense<0.000000e+00> : vector<16x256xf32>
    %35 = tpu.matmul %25, %34, %cst_20 {dimension_numbers = #tpu.dot_dimension_numbers<[1], [0], [0], [1], [0, 0, 1, 1], [], []>} : vector<16x256xf32>, vector<256x256xf32>, vector<16x256xf32> -> vector<16x256xf32>
    %c0_21 = arith.constant 0 : index
    %c0_22 = arith.constant 0 : index
    %36 = vector.load %arg10[%c0_21, %c0_22] : memref<1x256xf32, #tpu.memory_space<vmem>>, vector<1x256xf32>
    %37 = vector.broadcast %36 : vector<1x256xf32> to vector<16x256xf32>
    %38 = arith.addf %35, %37 : vector<16x256xf32>
    %c0_23 = arith.constant 0 : index
    %c0_24 = arith.constant 0 : index
    %39 = vector.load %arg11[%c0_23, %c0_24] : memref<256x256xf32, #tpu.memory_space<vmem>>, vector<256x256xf32>
    %cst_25 = arith.constant dense<0.000000e+00> : vector<16x256xf32>
    %40 = tpu.matmul %25, %39, %cst_25 {dimension_numbers = #tpu.dot_dimension_numbers<[1], [0], [0], [1], [0, 0, 1, 1], [], []>} : vector<16x256xf32>, vector<256x256xf32>, vector<16x256xf32> -> vector<16x256xf32>
    %c0_26 = arith.constant 0 : index
    %c0_27 = arith.constant 0 : index
    %41 = vector.load %arg12[%c0_26, %c0_27] : memref<1x256xf32, #tpu.memory_space<vmem>>, vector<1x256xf32>
    %42 = vector.broadcast %41 : vector<1x256xf32> to vector<16x256xf32>
    %43 = arith.addf %40, %42 : vector<16x256xf32>
    %c0_28 = arith.constant 0 : index
    %c0_29 = arith.constant 0 : index
    %c0_30 = arith.constant 0 : index
    %44 = vector.load %arg17[%c0_28, %c0_29, %c0_30] : memref<1x16x256xf32, #tpu.memory_space<vmem>>, vector<1x16x256xf32>
    %45 = vector.shape_cast %44 : vector<1x16x256xf32> to vector<16x256xf32>
    %46 = vector.shape_cast %38 : vector<16x256xf32> to vector<1x16x256xf32>
    tpu.vector_store %arg17[%c0_28, %c0_29, %c0_30], %46 {strides = array<i32>} : memref<1x16x256xf32, #tpu.memory_space<vmem>>, vector<1x16x256xf32>,
    %c0_31 = arith.constant 0 : index
    %c0_32 = arith.constant 0 : index
    %c0_33 = arith.constant 0 : index
    %47 = vector.load %arg18[%c0_31, %c0_32, %c0_33] : memref<1x16x256xf32, #tpu.memory_space<vmem>>, vector<1x16x256xf32>
    %48 = vector.shape_cast %47 : vector<1x16x256xf32> to vector<16x256xf32>
    %49 = vector.shape_cast %43 : vector<16x256xf32> to vector<1x16x256xf32>
    tpu.vector_store %arg18[%c0_31, %c0_32, %c0_33], %49 {strides = array<i32>} : memref<1x16x256xf32, #tpu.memory_space<vmem>>, vector<1x16x256xf32>,
    %c0_34 = arith.constant 0 : index
    %c0_35 = arith.constant 0 : index
    %50 = vector.load %arg3[%c0_34, %c0_35] : memref<16x256xf32, #tpu.memory_space<vmem>>, vector<16x256xf32>
    %c0_36 = arith.constant 0 : index
    %c0_37 = arith.constant 0 : index
    %51 = vector.load %arg4[%c0_36, %c0_37] : memref<16x256xf32, #tpu.memory_space<vmem>>, vector<16x256xf32>
    %52 = vector.extract_strided_slice %33 {offsets = [0, 128], sizes = [16, 128], strides = [1, 1]} : vector<16x256xf32> to vector<16x128xf32>
    %53 = vector.extract_strided_slice %33 {offsets = [0, 0], sizes = [16, 128], strides = [1, 1]} : vector<16x256xf32> to vector<16x128xf32>
    %54 = tpu.concatenate %52, %53 in 1 : vector<16x128xf32>, vector<16x128xf32> -> vector<16x256xf32>
    %55 = arith.mulf %33, %50 : vector<16x256xf32>
    %56 = arith.mulf %54, %51 : vector<16x256xf32>
    %57 = arith.addf %55, %56 : vector<16x256xf32>
    %cst_38 = arith.constant 1.250000e-01 : f32
    %58 = vector.broadcast %cst_38 : f32 to vector<16x256xf32>
    %59 = arith.mulf %57, %58 : vector<16x256xf32>
    %60 = vector.extract_strided_slice %38 {offsets = [0, 128], sizes = [16, 128], strides = [1, 1]} : vector<16x256xf32> to vector<16x128xf32>
    %61 = vector.extract_strided_slice %38 {offsets = [0, 0], sizes = [16, 128], strides = [1, 1]} : vector<16x256xf32> to vector<16x128xf32>
    %62 = tpu.concatenate %60, %61 in 1 : vector<16x128xf32>, vector<16x128xf32> -> vector<16x256xf32>
    %63 = arith.mulf %38, %50 : vector<16x256xf32>
    %64 = arith.mulf %62, %51 : vector<16x256xf32>
    %65 = arith.addf %63, %64 : vector<16x256xf32>
    %66 = vector.extract_strided_slice %59 {offsets = [0, 0], sizes = [16, 64], strides = [1, 1]} : vector<16x256xf32> to vector<16x64xf32>
    %c0_39 = arith.constant 0 : index
    %c0_40 = arith.constant 0 : index
    %c0_41 = arith.constant 0 : index
    %c0_42 = arith.constant 0 : index
    %67 = vector.load %arg14[%c0_39, %c0_40, %c0_41, %c0_42] : memref<1x4x16x64xf32, #tpu.memory_space<vmem>>, vector<1x1x16x64xf32>
    %68 = vector.shape_cast %67 : vector<1x1x16x64xf32> to vector<16x64xf32>
    %69 = vector.shape_cast %66 : vector<16x64xf32> to vector<1x1x16x64xf32>
    tpu.vector_store %arg14[%c0_39, %c0_40, %c0_41, %c0_42], %69 {strides = array<i32>} : memref<1x4x16x64xf32, #tpu.memory_space<vmem>>, vector<1x1x16x64xf32>,
    %70 = vector.extract_strided_slice %65 {offsets = [0, 0], sizes = [16, 64], strides = [1, 1]} : vector<16x256xf32> to vector<16x64xf32>
    %c0_43 = arith.constant 0 : index
    %c0_44 = arith.constant 0 : index
    %c0_45 = arith.constant 0 : index
    %c0_46 = arith.constant 0 : index
    %71 = vector.load %arg15[%c0_43, %c0_44, %c0_45, %c0_46] : memref<1x4x16x64xf32, #tpu.memory_space<vmem>>, vector<1x1x16x64xf32>
    %72 = vector.shape_cast %71 : vector<1x1x16x64xf32> to vector<16x64xf32>
    %73 = vector.shape_cast %70 : vector<16x64xf32> to vector<1x1x16x64xf32>
    tpu.vector_store %arg15[%c0_43, %c0_44, %c0_45, %c0_46], %73 {strides = array<i32>} : memref<1x4x16x64xf32, #tpu.memory_space<vmem>>, vector<1x1x16x64xf32>,
    %74 = vector.extract_strided_slice %43 {offsets = [0, 0], sizes = [16, 64], strides = [1, 1]} : vector<16x256xf32> to vector<16x64xf32>
    %c0_47 = arith.constant 0 : index
    %c0_48 = arith.constant 0 : index
    %c0_49 = arith.constant 0 : index
    %c0_50 = arith.constant 0 : index
    %75 = vector.load %arg16[%c0_47, %c0_48, %c0_49, %c0_50] : memref<1x4x16x64xf32, #tpu.memory_space<vmem>>, vector<1x1x16x64xf32>
    %76 = vector.shape_cast %75 : vector<1x1x16x64xf32> to vector<16x64xf32>
    %77 = vector.shape_cast %74 : vector<16x64xf32> to vector<1x1x16x64xf32>
    tpu.vector_store %arg16[%c0_47, %c0_48, %c0_49, %c0_50], %77 {strides = array<i32>} : memref<1x4x16x64xf32, #tpu.memory_space<vmem>>, vector<1x1x16x64xf32>,
    %78 = vector.extract_strided_slice %59 {offsets = [0, 64], sizes = [16, 64], strides = [1, 1]} : vector<16x256xf32> to vector<16x64xf32>
    %c0_51 = arith.constant 0 : index
    %c1 = arith.constant 1 : index
    %c0_52 = arith.constant 0 : index
    %c0_53 = arith.constant 0 : index
    %79 = vector.load %arg14[%c0_51, %c1, %c0_52, %c0_53] : memref<1x4x16x64xf32, #tpu.memory_space<vmem>>, vector<1x1x16x64xf32>
    %80 = vector.shape_cast %79 : vector<1x1x16x64xf32> to vector<16x64xf32>
    %81 = vector.shape_cast %78 : vector<16x64xf32> to vector<1x1x16x64xf32>
    tpu.vector_store %arg14[%c0_51, %c1, %c0_52, %c0_53], %81 {strides = array<i32>} : memref<1x4x16x64xf32, #tpu.memory_space<vmem>>, vector<1x1x16x64xf32>,
    %82 = vector.extract_strided_slice %65 {offsets = [0, 64], sizes = [16, 64], strides = [1, 1]} : vector<16x256xf32> to vector<16x64xf32>
    %c0_54 = arith.constant 0 : index
    %c1_55 = arith.constant 1 : index
    %c0_56 = arith.constant 0 : index
    %c0_57 = arith.constant 0 : index
    %83 = vector.load %arg15[%c0_54, %c1_55, %c0_56, %c0_57] : memref<1x4x16x64xf32, #tpu.memory_space<vmem>>, vector<1x1x16x64xf32>
    %84 = vector.shape_cast %83 : vector<1x1x16x64xf32> to vector<16x64xf32>
    %85 = vector.shape_cast %82 : vector<16x64xf32> to vector<1x1x16x64xf32>
    tpu.vector_store %arg15[%c0_54, %c1_55, %c0_56, %c0_57], %85 {strides = array<i32>} : memref<1x4x16x64xf32, #tpu.memory_space<vmem>>, vector<1x1x16x64xf32>,
    %86 = vector.extract_strided_slice %43 {offsets = [0, 64], sizes = [16, 64], strides = [1, 1]} : vector<16x256xf32> to vector<16x64xf32>
    %c0_58 = arith.constant 0 : index
    %c1_59 = arith.constant 1 : index
    %c0_60 = arith.constant 0 : index
    %c0_61 = arith.constant 0 : index
    %87 = vector.load %arg16[%c0_58, %c1_59, %c0_60, %c0_61] : memref<1x4x16x64xf32, #tpu.memory_space<vmem>>, vector<1x1x16x64xf32>
    %88 = vector.shape_cast %87 : vector<1x1x16x64xf32> to vector<16x64xf32>
    %89 = vector.shape_cast %86 : vector<16x64xf32> to vector<1x1x16x64xf32>
    tpu.vector_store %arg16[%c0_58, %c1_59, %c0_60, %c0_61], %89 {strides = array<i32>} : memref<1x4x16x64xf32, #tpu.memory_space<vmem>>, vector<1x1x16x64xf32>,
    %90 = vector.extract_strided_slice %59 {offsets = [0, 128], sizes = [16, 64], strides = [1, 1]} : vector<16x256xf32> to vector<16x64xf32>
    %c0_62 = arith.constant 0 : index
    %c2 = arith.constant 2 : index
    %c0_63 = arith.constant 0 : index
    %c0_64 = arith.constant 0 : index
    %91 = vector.load %arg14[%c0_62, %c2, %c0_63, %c0_64] : memref<1x4x16x64xf32, #tpu.memory_space<vmem>>, vector<1x1x16x64xf32>
    %92 = vector.shape_cast %91 : vector<1x1x16x64xf32> to vector<16x64xf32>
    %93 = vector.shape_cast %90 : vector<16x64xf32> to vector<1x1x16x64xf32>
    tpu.vector_store %arg14[%c0_62, %c2, %c0_63, %c0_64], %93 {strides = array<i32>} : memref<1x4x16x64xf32, #tpu.memory_space<vmem>>, vector<1x1x16x64xf32>,
    %94 = vector.extract_strided_slice %65 {offsets = [0, 128], sizes = [16, 64], strides = [1, 1]} : vector<16x256xf32> to vector<16x64xf32>
    %c0_65 = arith.constant 0 : index
    %c2_66 = arith.constant 2 : index
    %c0_67 = arith.constant 0 : index
    %c0_68 = arith.constant 0 : index
    %95 = vector.load %arg15[%c0_65, %c2_66, %c0_67, %c0_68] : memref<1x4x16x64xf32, #tpu.memory_space<vmem>>, vector<1x1x16x64xf32>
    %96 = vector.shape_cast %95 : vector<1x1x16x64xf32> to vector<16x64xf32>
    %97 = vector.shape_cast %94 : vector<16x64xf32> to vector<1x1x16x64xf32>
    tpu.vector_store %arg15[%c0_65, %c2_66, %c0_67, %c0_68], %97 {strides = array<i32>} : memref<1x4x16x64xf32, #tpu.memory_space<vmem>>, vector<1x1x16x64xf32>,
    %98 = vector.extract_strided_slice %43 {offsets = [0, 128], sizes = [16, 64], strides = [1, 1]} : vector<16x256xf32> to vector<16x64xf32>
    %c0_69 = arith.constant 0 : index
    %c2_70 = arith.constant 2 : index
    %c0_71 = arith.constant 0 : index
    %c0_72 = arith.constant 0 : index
    %99 = vector.load %arg16[%c0_69, %c2_70, %c0_71, %c0_72] : memref<1x4x16x64xf32, #tpu.memory_space<vmem>>, vector<1x1x16x64xf32>
    %100 = vector.shape_cast %99 : vector<1x1x16x64xf32> to vector<16x64xf32>
    %101 = vector.shape_cast %98 : vector<16x64xf32> to vector<1x1x16x64xf32>
    tpu.vector_store %arg16[%c0_69, %c2_70, %c0_71, %c0_72], %101 {strides = array<i32>} : memref<1x4x16x64xf32, #tpu.memory_space<vmem>>, vector<1x1x16x64xf32>,
    %102 = vector.extract_strided_slice %59 {offsets = [0, 192], sizes = [16, 64], strides = [1, 1]} : vector<16x256xf32> to vector<16x64xf32>
    %c0_73 = arith.constant 0 : index
    %c3 = arith.constant 3 : index
    %c0_74 = arith.constant 0 : index
    %c0_75 = arith.constant 0 : index
    %103 = vector.load %arg14[%c0_73, %c3, %c0_74, %c0_75] : memref<1x4x16x64xf32, #tpu.memory_space<vmem>>, vector<1x1x16x64xf32>
    %104 = vector.shape_cast %103 : vector<1x1x16x64xf32> to vector<16x64xf32>
    %105 = vector.shape_cast %102 : vector<16x64xf32> to vector<1x1x16x64xf32>
    tpu.vector_store %arg14[%c0_73, %c3, %c0_74, %c0_75], %105 {strides = array<i32>} : memref<1x4x16x64xf32, #tpu.memory_space<vmem>>, vector<1x1x16x64xf32>,
    %106 = vector.extract_strided_slice %65 {offsets = [0, 192], sizes = [16, 64], strides = [1, 1]} : vector<16x256xf32> to vector<16x64xf32>
    %c0_76 = arith.constant 0 : index
    %c3_77 = arith.constant 3 : index
    %c0_78 = arith.constant 0 : index
    %c0_79 = arith.constant 0 : index
    %107 = vector.load %arg15[%c0_76, %c3_77, %c0_78, %c0_79] : memref<1x4x16x64xf32, #tpu.memory_space<vmem>>, vector<1x1x16x64xf32>
    %108 = vector.shape_cast %107 : vector<1x1x16x64xf32> to vector<16x64xf32>
    %109 = vector.shape_cast %106 : vector<16x64xf32> to vector<1x1x16x64xf32>
    tpu.vector_store %arg15[%c0_76, %c3_77, %c0_78, %c0_79], %109 {strides = array<i32>} : memref<1x4x16x64xf32, #tpu.memory_space<vmem>>, vector<1x1x16x64xf32>,
    %110 = vector.extract_strided_slice %43 {offsets = [0, 192], sizes = [16, 64], strides = [1, 1]} : vector<16x256xf32> to vector<16x64xf32>
    %c0_80 = arith.constant 0 : index
    %c3_81 = arith.constant 3 : index
    %c0_82 = arith.constant 0 : index
    %c0_83 = arith.constant 0 : index
    %111 = vector.load %arg16[%c0_80, %c3_81, %c0_82, %c0_83] : memref<1x4x16x64xf32, #tpu.memory_space<vmem>>, vector<1x1x16x64xf32>
    %112 = vector.shape_cast %111 : vector<1x1x16x64xf32> to vector<16x64xf32>
    %113 = vector.shape_cast %110 : vector<16x64xf32> to vector<1x1x16x64xf32>
    tpu.vector_store %arg16[%c0_80, %c3_81, %c0_82, %c0_83], %113 {strides = array<i32>} : memref<1x4x16x64xf32, #tpu.memory_space<vmem>>, vector<1x1x16x64xf32>,
    return
  }
  func.func @transform_0(%arg0: i32, %arg1: i32) -> (i32, i32, i32) {
    %c0_i32 = arith.constant 0 : i32
    %c0_i32_0 = arith.constant 0 : i32
    return %arg0, %arg1, %c0_i32 : i32, i32, i32
  }
  func.func @transform_1(%arg0: i32, %arg1: i32) -> (i32, i32) {
    %c0_i32 = arith.constant 0 : i32
    %c0_i32_0 = arith.constant 0 : i32
    return %arg1, %c0_i32 : i32, i32
  }
  func.func @transform_2(%arg0: i32, %arg1: i32) -> (i32, i32) {
    %c0_i32 = arith.constant 0 : i32
    %c0_i32_0 = arith.constant 0 : i32
    return %arg1, %c0_i32 : i32, i32
  }
  func.func @transform_3(%arg0: i32, %arg1: i32) -> (i32, i32) {
    %c0_i32 = arith.constant 0 : i32
    %c0_i32_0 = arith.constant 0 : i32
    %c0_i32_1 = arith.constant 0 : i32
    return %c0_i32, %c0_i32_0 : i32, i32
  }
  func.func @transform_4(%arg0: i32, %arg1: i32) -> (i32, i32) {
    %c0_i32 = arith.constant 0 : i32
    %c0_i32_0 = arith.constant 0 : i32
    %c0_i32_1 = arith.constant 0 : i32
    return %c0_i32, %c0_i32_0 : i32, i32
  }
  func.func @transform_5(%arg0: i32, %arg1: i32) -> (i32, i32) {
    %c0_i32 = arith.constant 0 : i32
    %c0_i32_0 = arith.constant 0 : i32
    %c0_i32_1 = arith.constant 0 : i32
    return %c0_i32, %c0_i32_0 : i32, i32
  }
  func.func @transform_6(%arg0: i32, %arg1: i32) -> (i32, i32) {
    %c0_i32 = arith.constant 0 : i32
    %c0_i32_0 = arith.constant 0 : i32
    %c0_i32_1 = arith.constant 0 : i32
    return %c0_i32, %c0_i32_0 : i32, i32
  }
  func.func @transform_7(%arg0: i32, %arg1: i32) -> (i32, i32) {
    %c0_i32 = arith.constant 0 : i32
    %c0_i32_0 = arith.constant 0 : i32
    %c0_i32_1 = arith.constant 0 : i32
    return %c0_i32, %c0_i32_0 : i32, i32
  }
  func.func @transform_8(%arg0: i32, %arg1: i32) -> (i32, i32) {
    %c0_i32 = arith.constant 0 : i32
    %c0_i32_0 = arith.constant 0 : i32
    %c0_i32_1 = arith.constant 0 : i32
    return %c0_i32, %c0_i32_0 : i32, i32
  }
  func.func @transform_9(%arg0: i32, %arg1: i32) -> (i32, i32) {
    %c0_i32 = arith.constant 0 : i32
    %c0_i32_0 = arith.constant 0 : i32
    %c0_i32_1 = arith.constant 0 : i32
    return %c0_i32, %c0_i32_0 : i32, i32
  }
  func.func @transform_10(%arg0: i32, %arg1: i32) -> (i32, i32) {
    %c0_i32 = arith.constant 0 : i32
    %c0_i32_0 = arith.constant 0 : i32
    %c0_i32_1 = arith.constant 0 : i32
    return %c0_i32, %c0_i32_0 : i32, i32
  }
  func.func @transform_11(%arg0: i32, %arg1: i32) -> (i32, i32, i32) {
    %c0_i32 = arith.constant 0 : i32
    %c0_i32_0 = arith.constant 0 : i32
    return %arg0, %arg1, %c0_i32 : i32, i32, i32
  }
  func.func @transform_12(%arg0: i32, %arg1: i32) -> (i32, i32, i32, i32) {
    %c0_i32 = arith.constant 0 : i32
    %c0_i32_0 = arith.constant 0 : i32
    %c0_i32_1 = arith.constant 0 : i32
    return %arg0, %c0_i32, %arg1, %c0_i32_0 : i32, i32, i32, i32
  }
  func.func @transform_13(%arg0: i32, %arg1: i32) -> (i32, i32, i32, i32) {
    %c0_i32 = arith.constant 0 : i32
    %c0_i32_0 = arith.constant 0 : i32
    %c0_i32_1 = arith.constant 0 : i32
    return %arg0, %c0_i32, %arg1, %c0_i32_0 : i32, i32, i32, i32
  }
  func.func @transform_14(%arg0: i32, %arg1: i32) -> (i32, i32, i32, i32) {
    %c0_i32 = arith.constant 0 : i32
    %c0_i32_0 = arith.constant 0 : i32
    %c0_i32_1 = arith.constant 0 : i32
    return %arg0, %c0_i32, %arg1, %c0_i32_0 : i32, i32, i32, i32
  }
  func.func @transform_15(%arg0: i32, %arg1: i32) -> (i32, i32, i32) {
    %c0_i32 = arith.constant 0 : i32
    %c0_i32_0 = arith.constant 0 : i32
    return %arg0, %arg1, %c0_i32 : i32, i32, i32
  }
  func.func @transform_16(%arg0: i32, %arg1: i32) -> (i32, i32, i32) {
    %c0_i32 = arith.constant 0 : i32
    %c0_i32_0 = arith.constant 0 : i32
    return %arg0, %arg1, %c0_i32 : i32, i32, i32
  }
}

</mosaic_0001>

<bundles_post_ra>
// kernel: tpu_custom_call.1
= control target key start
LH: loop header
LB: loop body
LE: loop exit
PB: predicated region body
PF: predicated region fallthrough
CT: control target
= control target key end

     0   :  { %s3469_s0 = inlined_call_operand.hbm [shape: f32[2,32,256], index: 0, kind: input, shape index: {}]   ;;  %s3470_s1 = inlined_call_operand.hbm [shape: f32[32,256], index: 1, kind: input, shape index: {}]   ;;  %s3471_s2 = inlined_call_operand.hbm [shape: f32[32,256], index: 2, kind: input, shape index: {}]   ;;  %s3472_s3 = inlined_call_operand.vmem [shape: f32[1,256], index: 3, kind: input, shape index: {}]   ;;  %s3473_s4 = inlined_call_operand.vmem [shape: f32[1,256], index: 4, kind: input, shape index: {}]   ;;  %s3474_s5 = inlined_call_operand.hbm [shape: f32[256,256], index: 5, kind: input, shape index: {}]   ;;  %s3475_s6 = inlined_call_operand.vmem [shape: f32[1,256], index: 6, kind: input, shape index: {}]   ;;  %s3476_s7 = inlined_call_operand.hbm [shape: f32[256,256], index: 7, kind: input, shape index: {}]   ;;  %s3477_s8 = inlined_call_operand.vmem [shape: f32[1,256], index: 8, kind: input, shape index: {}]   ;;  %s3478_s9 = inlined_call_operand.hbm [shape: f32[256,256], index: 9, kind: input, shape index: {}]   ;;  %s3479_s10 = inlined_call_operand.vmem [shape: f32[1,256], index: 10, kind: input, shape index: {}]   ;;  %s3480_s11 = inlined_call_operand.hbm [shape: f32[2,32,256], index: 11, kind: output, shape index: {0}]   ;;  %s3481_s12 = inlined_call_operand.hbm [shape: f32[2,4,32,64], index: 12, kind: output, shape index: {1}]   ;;  %s3482_s13 = inlined_call_operand.hbm [shape: f32[2,4,32,64], index: 13, kind: output, shape index: {2}]   ;;  %s3483_s14 = inlined_call_operand.hbm [shape: f32[2,4,32,64], index: 14, kind: output, shape index: {3}]   ;;  %s3484_s15 = inlined_call_operand.hbm [shape: f32[2,32,256], index: 15, kind: output, shape index: {4}]   ;;  %s3485_s16 = inlined_call_operand.hbm [shape: f32[2,32,256], index: 16, kind: output, shape index: {5}]  }
   0x1   :  { %3520 = sst [smem:[#allocation48_spill]] %s3469_s0 }
   0x2   :  { %3521 = sst [smem:[#allocation49_spill]] %s3470_s1 }
   0x3   :  { %3522 = sst [smem:[#allocation50_spill]] %s3471_s2 }
   0x4   :  { %3523 = sst [smem:[#allocation51_spill]] %s3472_s3 }
   0x5   :  { %3524 = sst [smem:[#allocation52_spill]] %s3473_s4 }
   0x6   :  { %3525 = sst [smem:[#allocation53_spill]] %s3474_s5 }
   0x7   :  { %3526 = sst [smem:[#allocation54_spill]] %s3475_s6 }
   0x8   :  { %3527 = sst [smem:[#allocation55_spill]] %s3476_s7 }
   0x9   :  { %3528 = sst [smem:[#allocation56_spill]] %s3477_s8 }
   0xa   :  { %3529 = sst [smem:[#allocation57_spill]] %s3478_s9 }
   0xb   :  { %3530 = sst [smem:[#allocation58_spill]] %s3479_s10 }
   0xc   :  { %3531 = sst [smem:[#allocation59_spill]] %s3480_s11 }
   0xd   :  { %3532 = sst [smem:[#allocation60_spill]] %s3481_s12 }
   0xe   :  { %3533 = sst [smem:[#allocation61_spill]] %s3482_s13 }
   0xf   :  { %3534 = sst [smem:[#allocation62_spill]] %s3483_s14 }
  0x10   :  { %3535 = sst [smem:[#allocation63_spill]] %s3484_s15 }
  0x11   :  { %3536 = sst [smem:[#allocation64_spill]] %s3485_s16 }
  0x12   :  { %22 = vsyncpa [#allocation3], 0 }
  0x13   :  { %24 = vsyncpa [#allocation3 + $0x1], 0 }
  0x14   :  { %25 = vsyncpa [#allocation6], 0 }
  0x15   :  { %27 = vsyncpa [#allocation6 + $0x1], 0 }
  0x16   :  { %28 = vsyncpa [#allocation9], 0 }
  0x17   :  { %29 = vsyncpa [#allocation12], 0 }
  0x18   :  { %30 = vsyncpa [#allocation4], 0 }
  0x19   :  { %32 = vsyncpa [#allocation4 + $0x1], 0 }
  0x1a   :  { %33 = vsyncpa [#allocation15], 0 }
  0x1b   :  { %35 = vsyncpa [#allocation15 + $0x1], 0 }
  0x1c   :  { %36 = vsyncpa [#allocation18], 0 }
  0x1d   :  { %38 = vsyncpa [#allocation18 + $0x1], 0 }
  0x1e   :  { %39 = vsyncpa [#allocation21], 0 }
  0x1f   :  { %41 = vsyncpa [#allocation21 + $0x1], 0  ;;  %s2786_s21 = smov 0   ;;  %s2788_s22 = smov 0  }
  0x20   :  { %s2790_s23 = smov 0   ;;  %s2792_s24 = smov 0  }
  0x21   :  { %s2794_s25 = smov 0   ;;  %s2796_s26 = smov 0  }
  0x22   :  { %s2798_s27 = smov 0   ;;  %s2800_s28 = smov 0  }
  0x23   :  { %s2802_s29 = smov 0   ;;  %s2804_s30 = smov 0  }
  0x24   :  { %s2806_s0 = smov 0  }
  0x25 LB: > { %3537 = sst [smem:[#allocation36_spill]] %s2628_s22  ;;  %s2840_s17 = sadd.s32 4294967295, %s2664_s0   ;;  %s2664_s0 = sphi %s2806_s0, %s47_s0   ;;  %s2660_s30 = sphi %s2804_s30, %s3615_s30   ;;  %s2656_s29 = sphi %s2802_s29, %s3614_s29   ;;  %s2652_s28 = sphi %s2800_s28, %s3613_s28   ;;  %s2648_s27 = sphi %s2798_s27, %s3612_s27   ;;  %s2644_s26 = sphi %s2796_s26, %s3611_s26   ;;  %s2640_s25 = sphi %s2794_s25, %s3610_s25   ;;  %s2636_s24 = sphi %s2792_s24, %s3609_s24   ;;  %s2632_s23 = sphi %s2790_s23, %s3606_s23   ;;  %s2628_s22 = sphi %s2788_s22, %s3605_s22   ;;  %s2624_s21 = sphi %s2786_s21, %s3604_s21  }
  0x26   : > { %3538 = sst [smem:[#allocation37_spill]] %s2632_s23  ;;  %s3489_s18 = sadd.s32 4294967294, %s2664_s0  }
  0x27   : > { %3539 = sst [smem:[#allocation38_spill]] %s2636_s24  ;;  %p81_p0 = scmp.ne.s32.totalorder %s2640_s25, %s2636_s24 }
  0x28   : > { %3540 = sst [smem:[#allocation39_spill]] %s2648_s27  ;;  %p3499_p1 = scmp.eq.s32.totalorder %s2840_s17, 0 }
  0x29   : > { %3541 = sst [smem:[#allocation40_spill]] %s2652_s28  ;;  %p107_p2 = scmp.ne.s32.totalorder %s2628_s22, %s2624_s21 }
  0x2a   : > { %p2850_p4 = por %p3499_p1, %p81_p0  ;;  %p333_p5 = scmp.eq.s32.totalorder %s3489_s18, 3 }
  0x2b   : > { %p2858_p6 = por %p107_p2, %p3499_p1  ;;  %p1940_p7 = scmp.ge.s32.totalorder %s2664_s0, 1 }
  0x2c   : > { %s3542_s19 = scalar_select %p2850_p4, 1, 0 }
  0x2d   : > { %s3544_s20 = scalar_select %p2858_p6, 1, 0 }
  0x2e   : > { %3543 = sst [smem:[#allocation41_spill]] %s3542_s19  ;;  %p2863_p8 = por %p333_p5, %p81_p0 }
  0x2f   : > { %3545 = sst [smem:[#allocation42_spill]] %s3544_s20  ;;  %p480_p9 = scmp.lt.s32.totalorder %s2664_s0, 5 }
  0x30   : > { %s3546_s16 = scalar_select %p2863_p8, 1, 0 }
  0x31   : > { %p2868_p10 = pnand %p1940_p7, %p480_p9  ;;  %s2666_s24 = smov [#allocation8]  }
  0x32   : > { %3547 = sst [smem:[#allocation43_spill]] %s3546_s16  ;;  %s498_s15 = sshll.u32 %s2666_s24, 4  ;;  %s499_s15 = int_to_ptr.vmem [resolvable:$true] %s498_s15 }
  0x33   : > { %p2138_p11 = pneg %p2868_p10  ;;  %s56_s14 = sadd.s32 1, %s2656_s29 }
  0x34   : > { %s2317_s16 = scalar_lea.vmem %s499_s15, 8192  ;;  %p2325_p7 = scmp.lt.s32.totalorder %s499_s15, %s499_s15 }
  0x35   : > { %p2876_p12 = pnand %p2138_p11, %p3499_p1  ;;  %p2318_p0 = scmp.ne.s32.totalorder %s499_s15, %s2317_s16 }
  0x36   : > { %p2326_p9 = scmp.lt.s32.totalorder %s2317_s16, %s2317_s16 }
  0x37   : > { %p3502_p13 = pneg %p2876_p12 }
  0x38   : > { %p2327_p3 = por %p2326_p9, %p2325_p7 }
  0x39   : > { %p2320_p2 = pnand %p2318_p0, %p3502_p13 }
  0x3b   : > { %p2321_p5 = pneg %p2320_p2 }
  0x3d   : > { %p2328_p8 = pnand %p2327_p3, %p2321_p5 }
  0x3f   : > { %2331 = shalt.err (!%p2328_p8)
}
  0x40   : > { %s3493_s24 = smov 256   ;;  %s3495_s13 = smov 16  }
  0x41   : > { %s3550_s5 = sld [smem:[#allocation53_spill]]  ;;  %p2894_p3 = scmp.ge.s32.totalorder %s56_s14, 2 }
  0x42   : > { %p3501_p8 = scmp.eq.s32.totalorder %s2664_s0, 0  ;;  %s94_s11 = sadd.s32 1, %s2632_s23 }
  0x43   : > { %p101_p11 = scmp.ne.s32.totalorder %s2632_s23, %s2628_s22  ;;  %s3617_s14 = smov (%p2894_p3, %s56_s14), 0 }
  0x44   : > { %3552 = sst [smem:[#allocation44_spill]] %s3617_s14  ;;  %p3500_p2 = scmp.lt.s32.totalorder %s2664_s0, 4 }
  0x45   : > { %p103_p0 = por %p101_p11, %p3501_p8  ;;  %s2911_s28 = ssub.s32 %s2656_s29, %s3617_s14 }
  0x46   : > { %s571_s12 = sand.u32 1, %s2664_s0   ;;  %p92_p5 = scmp.eq.s32.totalorder %s2911_s28, 0 }
  0x47   : > { %2141 = dma.hbm_to_vmem [thread:$0]  (!%p2876_p12), %s3550_s5, 8192, %s499_s15, [#allocation9], %s3493_s24, %s3493_s24, %s3495_s13  }
  0x48   : > { %s573_s15 = sand.u32 1, %s2632_s23   ;;  %s2020_s16 = sshll.u32 %s2656_s29, 9 }
  0x49   : > { %s2918_s24 = scalar_select %p92_p5, %s2632_s23, %s94_s11  }
  0x4a   : > { %s1950_s13 = sshll.u32 %s573_s15, 5  ;;  %s3554_s1 = sld [smem:[#allocation49_spill]] }
  0x4b   : > { %3553 = sst [smem:[#allocation45_spill]] %s2918_s24  ;;  %p2925_p7 = pnand %p3500_p2, %p103_p0 }
  0x4c   : > { %s575_s14 = scalar_lea.vmem [#allocation5], %s1950_s13  ;;  %s2929_s3 = scalar_lea.sflag [#allocation6], %s571_s12 }
  0x4d   : > { %s583_s4 = sshll.u32 %s575_s14, 4  ;;  %p3509_p9 = pneg %p2925_p7  ;;  %s584_s4 = int_to_ptr.vmem [resolvable:$true] %s583_s4 }
  0x4e   : > { %s2345_s11 = scalar_lea.vmem %s584_s4, 512  ;;  %s2669_s5 = smov [#allocation5]  }
  0x4f   : > { %p2346_p11 = scmp.ne.s32.totalorder %s584_s4, %s2345_s11  ;;  %s2350_s27 = sshll.u32 %s2669_s5, 4  ;;  %s2351_s27 = int_to_ptr.vmem [resolvable:$false] %s2350_s27 }
  0x50   : > { %s582_s8 = scalar_lea.hbm %s3554_s1, %s2020_s16  ;;  %s2352_s15 = scalar_lea.vmem %s2351_s27, 1024 }
  0x51   : > { %p2348_p5 = pnand %p2346_p11, %p3509_p9  ;;  %p2353_p0 = scmp.lt.s32.totalorder %s584_s4, %s2351_s27 }
  0x52   : > { %p2354_p2 = scmp.lt.s32.totalorder %s2352_s15, %s2345_s11 }
  0x53   : > { %p2349_p1 = pneg %p2348_p5 }
  0x54   : > { %p2355_p8 = por %p2354_p2, %p2353_p0 }
  0x56   : > { %p2356_p13 = pnand %p2355_p8, %p2349_p1 }
  0x58   : > { %2359 = shalt.err (!%p2356_p13)
}
  0x59   : > { %s3556_s14 = smov 16   ;;  %s3557_s12 = smov 256  }
  0x5a   : > { %2154 = dma.hbm_to_vmem [thread:$0]  (!%p2925_p7), %s582_s8, 512, %s584_s4, %s2929_s3, %s3557_s12, %s3557_s12, %s3556_s14  }
  0x5b   : > { %s3558_s2 = sld [smem:[#allocation50_spill]]  ;;  %s597_s5 = scalar_lea.vmem [#allocation7], %s1950_s13 }
  0x5c   : > { %s605_s20 = sshll.u32 %s597_s5, 4  ;;  %s2670_s11 = smov [#allocation10]   ;;  %s2947_s20 = int_to_ptr.vmem [resolvable:$true] %s605_s20 }
  0x5d   : > { %s514_s27 = sshll.u32 %s2670_s11, 4  ;;  %s2671_s15 = smov [#allocation11]   ;;  %s515_s27 = int_to_ptr.vmem [resolvable:$true] %s514_s27 }
  0x5e   : > { %s530_s22 = sshll.u32 %s2671_s15, 4  ;;  %s2371_s19 = scalar_lea.vmem %s515_s27, 8192  ;;  %s531_s22 = int_to_ptr.vmem [resolvable:$true] %s530_s22 }
  0x5f   : > { %p2372_p1 = scmp.ne.s32.totalorder %s515_s27, %s2371_s19  ;;  %p3559_p13 = pneg %p2876_p12 }
  0x60   : > { %p2379_p11 = scmp.lt.s32.totalorder %s515_s27, %s515_s27  ;;  %p2380_p5 = scmp.lt.s32.totalorder %s2371_s19, %s2371_s19 }
  0x61   : > { %s2945_s23 = scalar_lea.hbm %s3558_s2, %s2020_s16  ;;  %p2374_p8 = pnand %p2372_p1, %p3559_p13 }
  0x62   : > { %p2381_p0 = por %p2380_p5, %p2379_p11 }
  0x63   : > { %p2375_p2 = pneg %p2374_p8 }
  0x65   : > { %p2382_p9 = pnand %p2381_p0, %p2375_p2 }
  0x67   : > { %2385 = shalt.err (!%p2382_p9)
}
  0x68   : > { %s3560_s7 = sld [smem:[#allocation55_spill]]  ;;  %s2397_s8 = scalar_lea.vmem %s531_s22, 8192 }
  0x69   : > { %p2398_p6 = scmp.ne.s32.totalorder %s531_s22, %s2397_s8  ;;  %p3561_p1 = pmov %p3559_p13 }
  0x6a   : > { %p2405_p11 = scmp.lt.s32.totalorder %s531_s22, %s531_s22  ;;  %p2406_p2 = scmp.lt.s32.totalorder %s2397_s8, %s2397_s8 }
  0x6b   : > { %p2400_p13 = pnand %p2398_p6, %p3561_p1 }
  0x6c   : > { %p2407_p9 = por %p2406_p2, %p2405_p11 }
  0x6d   : > { %p2401_p8 = pneg %p2400_p13 }
  0x6e   : > { %2144 = dma.hbm_to_vmem [thread:$0]  (!%p2876_p12), %s3560_s7, 8192, %s515_s27, [#allocation9], %s3557_s12, %s3557_s12, %s3556_s14  }
  0x6f   : > { %p2408_p5 = pnand %p2407_p9, %p2401_p8 }
  0x71   : > { %2411 = shalt.err (!%p2408_p5)
}
  0x72   : > { %s3562_s9 = sld [smem:[#allocation57_spill]]  ;;  %s68_s18 = sadd.s32 1, %s2644_s26 }
  0x73   : > { %s59_s24 = sadd.s32 1, %s2660_s30  ;;  %p75_p6 = scmp.ne.s32.totalorder %s2644_s26, %s2640_s25 }
  0x74   : > { %s3619_s24 = smov (!%p2894_p3, %s59_s24), %s2660_s30  ;;  %p3563_p0 = scmp.eq.s32.totalorder %s2664_s0, 0 }
  0x75   : > { %p3565_p13 = scmp.eq.s32.totalorder %s2840_s17, 3  ;;  %p61_p11 = scmp.ge.s32.totalorder %s3619_s24, 2 }
  0x76   : > { %p2980_p1 = por %p3563_p0, %p75_p6  ;;  %s2018_s10 = sshll.u32 %s2656_s29, 2 }
  0x77   : > { %p2986_p8 = por %p3565_p13, %p75_p6  ;;  %s3621_s24 = smov (%p61_p11, %s3619_s24), 0 }
  0x78   : > { %2147 = dma.hbm_to_vmem [thread:$0]  (!%p2876_p12), %s3562_s9, 8192, %s531_s22, [#allocation12], %s3557_s12, %s3557_s12, %s3556_s14  }
  0x79   : > { %s3566_s5 = scalar_select %p2986_p8, 1, 0 }
  0x7a   : > { %s3511_s22 = sand.u32 1, %s2644_s26   ;;  %3568 = sst [smem:[#allocation47_spill]] %s3621_s24 }
  0x7b   : > { %3567 = sst [smem:[#allocation46_spill]] %s3566_s5  ;;  %s1945_s11 = sshll.u32 %s3511_s22, 5 }
  0x7c   : > { %s63_s27 = ssub.s32 %s2660_s30, %s3621_s24  ;;  %s1948_s15 = sshll.u32 %s2660_s30, 3 }
  0x7d   : > { %s65_s1 = sor.u32 %s2911_s28, %s63_s27  ;;  %s558_s4 = sadd.s32 %s2018_s10, %s1948_s15 }
  0x7e   : > { %p66_p12 = scmp.eq.s32.totalorder %s65_s1, 0  ;;  %s1949_s8 = sshll.u32 %s558_s4, 7 }
  0x7f   : > { %s3569_s2 = sld [smem:[#allocation48_spill]]  ;;  %s551_s9 = scalar_lea.vmem [#allocation2], %s1945_s11 }
  0x80   : > { %s561_s22 = sshll.u32 %s551_s9, 4  ;;  %p3570_p3 = scmp.lt.s32.totalorder %s2664_s0, 4  ;;  %s3008_s22 = int_to_ptr.vmem [resolvable:$true] %s561_s22 }
  0x81   : > { %s3006_s5 = scalar_select %p66_p12, %s2644_s26, %s68_s18  }
  0x82   : > { %p3014_p2 = pnand %p3570_p3, %p2980_p1  ;;  %s2425_s28 = scalar_lea.vmem %s2947_s20, 512 }
  0x83   : > { %p2426_p9 = scmp.ne.s32.totalorder %s2947_s20, %s2425_s28  ;;  %p3572_p5 = pneg %p2925_p7 }
  0x85   : > { %s3003_s7 = scalar_lea.hbm %s3569_s2, %s1949_s8  ;;  %p2428_p6 = pnand %p2426_p9, %p3572_p5 }
  0x86   : > { %s2672_s2 = smov [#allocation7]  }
  0x87   : > { %p2429_p0 = pneg %p2428_p6  ;;  %s2430_s10 = sshll.u32 %s2672_s2, 4  ;;  %s2431_s10 = int_to_ptr.vmem [resolvable:$false] %s2430_s10 }
  0x88   : > { %s2432_s9 = scalar_lea.vmem %s2431_s10, 1024  ;;  %p2433_p13 = scmp.lt.s32.totalorder %s2947_s20, %s2431_s10 }
  0x89   : > { %p2434_p11 = scmp.lt.s32.totalorder %s2432_s9, %s2425_s28 }
  0x8b   : > { %p2435_p12 = por %p2434_p11, %p2433_p13 }
  0x8d   : > { %p2436_p8 = pnand %p2435_p12, %p2429_p0 }
  0x8f   : > { %2439 = shalt.err (!%p2436_p8)
}
  0x90   : > { %2157 = dma.hbm_to_vmem [thread:$0]  (!%p2925_p7), %s2945_s23, 512, %s2947_s20, %s2929_s3, %s3557_s12, %s3557_s12, %s3556_s14  }
  0x91   : > { %s3573_s18 = sand.u32 1, %s2644_s26   ;;  %p2442_p1 = pneg %p3014_p2 }
  0x92   : > { %s548_s16 = scalar_lea.sflag [#allocation3], %s3573_s18  ;;  %s2453_s11 = scalar_lea.vmem %s3008_s22, 512 }
  0x93   : > { %p2454_p8 = scmp.ne.s32.totalorder %s3008_s22, %s2453_s11  ;;  %s2673_s6 = smov [#allocation2]  }
  0x94   : > { %s2458_s27 = sshll.u32 %s2673_s6, 4  ;;  %s2459_s27 = int_to_ptr.vmem [resolvable:$false] %s2458_s27 }
  0x95   : > { %p2456_p3 = pnand %p2454_p8, %p2442_p1  ;;  %s2460_s15 = scalar_lea.vmem %s2459_s27, 1024 }
  0x96   : > { %p2461_p5 = scmp.lt.s32.totalorder %s3008_s22, %s2459_s27  ;;  %p2462_p6 = scmp.lt.s32.totalorder %s2460_s15, %s2453_s11 }
  0x97   : > { %p2457_p9 = pneg %p2456_p3 }
  0x98   : > { %p2463_p0 = por %p2462_p6, %p2461_p5 }
  0x9a   : > { %p2464_p13 = pnand %p2463_p0, %p2457_p9 }
  0x9c   : > { %2467 = shalt.err (!%p2464_p13)
}
  0x9d   : > { %2151 = dma.hbm_to_vmem [thread:$0]  (!%p3014_p2), %s3003_s7, 512, %s3008_s22, %s548_s16, %s3557_s12, %s3557_s12, %s3556_s14  }
  0x9e   : > { %617 = sbr.rel (%p2868_p10) target bundleno = 950 (0x3b6), region = 64  ;;  %s3049_s23 = sand.u32 (!%p2868_p10), 1, %s2640_s25  }
  0x9f   : > { %s3052_s20 = sshll.u32 (!%p2868_p10), %s3049_s23, 5  ;;  %s620_s1 = scalar_lea.sflag (!%p2868_p10), [#allocation3], %s3049_s23 }
  0xa0   : > { %s623_s24 = scalar_lea.vmem (!%p2868_p10), [#allocation2], %s3052_s20 }
  0xa3   : > { %2591 = dma.done.wait (%p2850_p4), %s620_s1, 512  }
  0xa4   : > { %2593 = vsyncadd (%p2850_p4), %s620_s1, 4294966784  ;;  %s3575_s7 = sld [smem:[#allocation36_spill]]  ;;  %s3061_s14 = sand.u32 1, %s2840_s17  }
  0xa5   : > { %s3576_s21 = sld [smem:[#allocation42_spill]]  ;;  %s629_s4 = scalar_lea.sflag [#allocation6], %s3061_s14 }
  0xaa   : > { %s630_s12 = sand.u32 1, %s3575_s7  }
  0xab   : > { %s1960_s22 = sshll.u32 %s630_s12, 5  ;;  %p3577_p10 = scmp.ne.s32.totalorder %s3576_s21, 0 }
  0xac   : > { %s3065_s8 = scalar_lea.vmem [#allocation5], %s1960_s22 }
  0xad   : > { %2595 = dma.done.wait (%p3577_p10), %s629_s4, 1024  }
  0xae   : > { %2597 = vsyncadd (%p3577_p10), %s629_s4, 4294966272  ;;  %s3071_s13 = scalar_lea.vmem [#allocation7], %s1960_s22  ;;  %p3578_p4 = scmp.eq.s32.totalorder %s2840_s17, 0 }
  0xb0   : > { %2599 = dma.done.wait (%p3578_p4), [#allocation9], 16384   ;;  %p3579_p7 = pmov %p3578_p4 }
  0xb1   : > { %p3580_p2 = pmov %p3578_p4 }
  0xb2   : > { %2601 = vsyncadd (%p3579_p7), [#allocation9], 4294950912 }
  0xb3   : > { %2603 = dma.done.wait (%p3580_p2), [#allocation12], 8192   ;;  %p3581_p11 = pmov %p3580_p2 }
  0xb4   : > { %v3081_v0 = vld [vmem:[%s623_s24] sm:$0xff]  ;;  %v3083_v1 = vld [vmem:[%s623_s24 + $0x8] sm:$0xff]  ;;  %v3085_v2 = vld [vmem:[%s623_s24 + $0x10] sm:$0xff]  ;;  %s3582_s28 = sld [smem:[#allocation51_spill]]  ;;  %s3134_s18 = scalar_lea.vmem [#allocation13], %s3052_s20  ;;  %vm1322_vm0 = vcmask 523264  }
  0xb5   : > { %2605 = vsyncadd (%p3581_p11), [#allocation12], 4294959104  ;;  %v752_v3 = vadd.f32 %v3083_v1, %v3081_v0  ;;  %v3089_v4 = vld [vmem:[%s623_s24 + $0x18] sm:$0xff]  ;;  %v849_v8 = vld [vmem:[#allocation8 + $0xf0] sm:$0xff]  ;;  %s3583_s9 = sld [smem:[#allocation52_spill]]  ;;  %s3163_s1 = scalar_lea.vmem [#allocation19], %s3052_s20 }
  0xb6   : > { %v755_v5 = vadd.f32 %v3089_v4, %v3085_v2  ;;  %v850_v6 = vld [vmem:[#allocation8 + $0xf8] sm:$0xff]  ;;  %v1002_v9 = vld [vmem:[#allocation10 + $0xf0] sm:$0xff]  ;;  %v848_v10 = vld [vmem:[#allocation8 + $0xe8] sm:$0xff]  ;;  %s3584_s6 = sld [smem:[#allocation54_spill]]  ;;  %s3169_s24 = sshll.u32 %s3049_s23, 6 }
  0xb7   : > { %753 = vadd.xlane.f32.xlu0 %v752_v3  ;;  %v1003_v7 = vld [vmem:[#allocation10 + $0xf8] sm:$0xff]  ;;  %895 = vmatprep.subr.mxu0 %v850_v6  ;;  %v1001_v11 = vld [vmem:[#allocation10 + $0xe8] sm:$0xff]  ;;  %v847_v12 = vld [vmem:[#allocation8 + $0xe0] sm:$0xff]  ;;  %s3585_s3 = sld [smem:[#allocation56_spill]]  ;;  %s2674_s7 = smov 64  }
  0xb8   : > { %1048 = vmatprep.subr.mxu1 %v1003_v7  ;;  %896 = vmatpush1.msra.mxu0 %v849_v8  ;;  %v1000_v13 = vld [vmem:[#allocation10 + $0xe0] sm:$0xff]  ;;  %v846_v14 = vld [vmem:[#allocation8 + $0xd8] sm:$0xff]  ;;  %v845_v16 = vld [vmem:[#allocation8 + $0xd0] sm:$0xff]  ;;  %s3179_s21 = scalar_lea.vmem [#allocation16], %s3169_s24  ;;  %s3188_s12 = scalar_lea.vmem [#allocation14], %s3169_s24 }
  0xb9   : > { %1049 = vmatpush1.msra.mxu1 %v1002_v9  ;;  %897 = vmatprep.subr.mxu0 %v848_v10  ;;  %v999_v15 = vld [vmem:[#allocation10 + $0xd8] sm:$0xff]  ;;  %v998_v17 = vld [vmem:[#allocation10 + $0xd0] sm:$0xff]  ;;  %v844_v18 = vld [vmem:[#allocation8 + $0xc8] sm:$0xff]  ;;  %s3586_s22 = sld [smem:[#allocation39_spill]]  ;;  %s1446_s2 = sshll.u32 %s3134_s18, 4  ;;  %s3222_s2 = int_to_ptr.vmem [resolvable:$true] %s1446_s2 }
  0xba   : > { %1050 = vmatprep.subr.mxu1 %v1001_v11  ;;  %898 = vmatpush1.msra.mxu0 %v847_v12  ;;  %v997_v19 = vld [vmem:[#allocation10 + $0xc8] sm:$0xff]  ;;  %v843_v20 = vld [vmem:[#allocation8 + $0xc0] sm:$0xff]  ;;  %v842_v22 = vld [vmem:[#allocation8 + $0xb8] sm:$0xff]  ;;  %s3587_s4 = sld [smem:[#allocation40_spill]] }
  0xbb   : > { %756 = vadd.xlane.f32.xlu0 %v755_v5  ;;  %1051 = vmatpush1.msra.mxu1 %v1000_v13  ;;  %v996_v21 = vld [vmem:[#allocation10 + $0xc0] sm:$0xff]  ;;  %v995_v23 = vld [vmem:[#allocation10 + $0xb8] sm:$0xff]  ;;  %v841_v24 = vld [vmem:[#allocation8 + $0xb0] sm:$0xff]  ;;  %s3589_s16 = sld [smem:[#allocation59_spill]] }
  0xbc   : > { %899 = vmatprep.subr.mxu0 %v846_v14  ;;  %1052 = vmatprep.subr.mxu1 %v999_v15  ;;  %v994_v25 = vld [vmem:[#allocation10 + $0xb0] sm:$0xff]  ;;  %v840_v26 = vld [vmem:[#allocation8 + $0xa8] sm:$0xff]  ;;  %v839_v28 = vld [vmem:[#allocation8 + $0xa0] sm:$0xff]  ;;  %s3590_s15 = sld [smem:[#allocation58_spill]] }
  0xbd   : > { %900 = vmatpush1.msra.mxu0 %v845_v16  ;;  %1053 = vmatpush1.msra.mxu1 %v998_v17  ;;  %v993_v27 = vld [vmem:[#allocation10 + $0xa8] sm:$0xff]  ;;  %v992_v29 = vld [vmem:[#allocation10 + $0xa0] sm:$0xff]  ;;  %v838_v30 = vld [vmem:[#allocation8 + $0x98] sm:$0xff] }
  0xbe   : > { %901 = vmatprep.subr.mxu0 %v844_v18  ;;  %1054 = vmatprep.subr.mxu1 %v997_v19  ;;  %v991_v31 = vld [vmem:[#allocation10 + $0x98] sm:$0xff]  ;;  %v837_v32 = vld [vmem:[#allocation8 + $0x90] sm:$0xff]  ;;  %v836_v34 = vld [vmem:[#allocation8 + $0x88] sm:$0xff] }
  0xbf   : > { %902 = vmatpush1.msra.mxu0 %v843_v20  ;;  %1055 = vmatpush1.msra.mxu1 %v996_v21  ;;  %v990_v33 = vld [vmem:[#allocation10 + $0x90] sm:$0xff]  ;;  %v989_v35 = vld [vmem:[#allocation10 + $0x88] sm:$0xff]  ;;  %v835_v36 = vld [vmem:[#allocation8 + $0x80] sm:$0xff] }
  0xc0   : > { %903 = vmatprep.subr.mxu0 %v842_v22  ;;  %1056 = vmatprep.subr.mxu1 %v995_v23  ;;  %v988_v37 = vld [vmem:[#allocation10 + $0x80] sm:$0xff]  ;;  %v834_v38 = vld [vmem:[#allocation8 + $0x78] sm:$0xff]  ;;  %v833_v40 = vld [vmem:[#allocation8 + $0x70] sm:$0xff]  ;;  %s1997_s17 = sshll.u32 %s3587_s4, 3 }
  0xc1   : > { %904 = vmatpush1.msra.mxu0 %v841_v24  ;;  %1057 = vmatpush1.msra.mxu1 %v994_v25  ;;  %v987_v39 = vld [vmem:[#allocation10 + $0x78] sm:$0xff]  ;;  %v986_v41 = vld [vmem:[#allocation10 + $0x70] sm:$0xff]  ;;  %v832_v42 = vld [vmem:[#allocation8 + $0x68] sm:$0xff] }
  0xc2   : > { %905 = vmatprep.subr.mxu0 %v840_v26  ;;  %1058 = vmatprep.subr.mxu1 %v993_v27  ;;  %v985_v43 = vld [vmem:[#allocation10 + $0x68] sm:$0xff]  ;;  %v831_v44 = vld [vmem:[#allocation8 + $0x60] sm:$0xff]  ;;  %v830_v46 = vld [vmem:[#allocation8 + $0x58] sm:$0xff] }
  0xc3   : > { %906 = vmatpush1.msra.mxu0 %v839_v28  ;;  %1059 = vmatpush1.msra.mxu1 %v992_v29  ;;  %v984_v45 = vld [vmem:[#allocation10 + $0x60] sm:$0xff]  ;;  %v983_v47 = vld [vmem:[#allocation10 + $0x58] sm:$0xff]  ;;  %v829_v48 = vld [vmem:[#allocation8 + $0x50] sm:$0xff] }
  0xc4   : > { %907 = vmatprep.subr.mxu0 %v838_v30  ;;  %1060 = vmatprep.subr.mxu1 %v991_v31  ;;  %v982_v49 = vld [vmem:[#allocation10 + $0x50] sm:$0xff]  ;;  %v828_v50 = vld [vmem:[#allocation8 + $0x48] sm:$0xff]  ;;  %v827_v52 = vld [vmem:[#allocation8 + $0x40] sm:$0xff] }
  0xc5   : > { %908 = vmatpush1.msra.mxu0 %v837_v32  ;;  %1061 = vmatpush1.msra.mxu1 %v990_v33  ;;  %v981_v51 = vld [vmem:[#allocation10 + $0x48] sm:$0xff]  ;;  %v980_v53 = vld [vmem:[#allocation10 + $0x40] sm:$0xff]  ;;  %v826_v54 = vld [vmem:[#allocation8 + $0x38] sm:$0xff] }
  0xc6   : > { %909 = vmatprep.subr.mxu0 %v836_v34  ;;  %1062 = vmatprep.subr.mxu1 %v989_v35  ;;  %v979_v55 = vld [vmem:[#allocation10 + $0x38] sm:$0xff]  ;;  %v825_v56 = vld [vmem:[#allocation8 + $0x30] sm:$0xff]  ;;  %v824_v58 = vld [vmem:[#allocation8 + $0x28] sm:$0xff] }
  0xc7   : > { %910 = vmatpush1.msra.mxu0 %v835_v36  ;;  %1063 = vmatpush1.msra.mxu1 %v988_v37  ;;  %v978_v57 = vld [vmem:[#allocation10 + $0x30] sm:$0xff]  ;;  %v977_v59 = vld [vmem:[#allocation10 + $0x28] sm:$0xff]  ;;  %v823_v60 = vld [vmem:[#allocation8 + $0x20] sm:$0xff] }
  0xc8   : > { %911 = vmatprep.subr.mxu0 %v834_v38  ;;  %1064 = vmatprep.subr.mxu1 %v987_v39  ;;  %v976_v61 = vld [vmem:[#allocation10 + $0x20] sm:$0xff]  ;;  %v822_v62 = vld [vmem:[#allocation8 + $0x18] sm:$0xff]  ;;  %v821_v3 = vld [vmem:[#allocation8 + $0x10] sm:$0xff] }
  0xc9   : > { %912 = vmatpush1.msra.mxu0 %v833_v40  ;;  %1065 = vmatpush1.msra.mxu1 %v986_v41  ;;  %v975_v63 = vld [vmem:[#allocation10 + $0x18] sm:$0xff]  ;;  %v974_v5 = vld [vmem:[#allocation10 + $0x10] sm:$0xff]  ;;  %v820_v6 = vld [vmem:[#allocation8 + $0x8] sm:$0xff] }
  0xca   : > { %913 = vmatprep.subr.mxu0 %v832_v42  ;;  %1066 = vmatprep.subr.mxu1 %v985_v43  ;;  %v973_v7 = vld [vmem:[#allocation10 + $0x8] sm:$0xff]  ;;  %v819_v8 = vld [vmem:[#allocation8] sm:$0xff]  ;;  %v882_v10 = vld [vmem:[#allocation8 + $0x1f8] sm:$0xff] }
  0xcb   : > { %914 = vmatpush1.msra.mxu0 %v831_v44  ;;  %1067 = vmatpush1.msra.mxu1 %v984_v45  ;;  %v972_v9 = vld [vmem:[#allocation10] sm:$0xff]  ;;  %v1035_v11 = vld [vmem:[#allocation10 + $0x1f8] sm:$0xff]  ;;  %v881_v12 = vld [vmem:[#allocation8 + $0x1f0] sm:$0xff] }
  0xcc   : > { %915 = vmatprep.subr.mxu0 %v830_v46  ;;  %1068 = vmatprep.subr.mxu1 %v983_v47  ;;  %v1034_v13 = vld [vmem:[#allocation10 + $0x1f0] sm:$0xff]  ;;  %v880_v14 = vld [vmem:[#allocation8 + $0x1e8] sm:$0xff]  ;;  %v879_v16 = vld [vmem:[#allocation8 + $0x1e0] sm:$0xff] }
  0xcd   : > { %916 = vmatpush1.msra.mxu0 %v829_v48  ;;  %1069 = vmatpush1.msra.mxu1 %v982_v49  ;;  %v1033_v15 = vld [vmem:[#allocation10 + $0x1e8] sm:$0xff]  ;;  %v1032_v17 = vld [vmem:[#allocation10 + $0x1e0] sm:$0xff]  ;;  %v878_v18 = vld [vmem:[#allocation8 + $0x1d8] sm:$0xff] }
  0xce   : > { %917 = vmatprep.subr.mxu0 %v828_v50  ;;  %1070 = vmatprep.subr.mxu1 %v981_v51  ;;  %v1031_v19 = vld [vmem:[#allocation10 + $0x1d8] sm:$0xff]  ;;  %v877_v20 = vld [vmem:[#allocation8 + $0x1d0] sm:$0xff]  ;;  %v876_v22 = vld [vmem:[#allocation8 + $0x1c8] sm:$0xff] }
  0xcf   : > { %918 = vmatpush1.msra.mxu0 %v827_v52  ;;  %1071 = vmatpush1.msra.mxu1 %v980_v53  ;;  %v1030_v21 = vld [vmem:[#allocation10 + $0x1d0] sm:$0xff]  ;;  %v1029_v23 = vld [vmem:[#allocation10 + $0x1c8] sm:$0xff]  ;;  %v875_v24 = vld [vmem:[#allocation8 + $0x1c0] sm:$0xff] }
  0xd0   : > { %919 = vmatprep.subr.mxu0 %v826_v54  ;;  %1072 = vmatprep.subr.mxu1 %v979_v55  ;;  %v1028_v25 = vld [vmem:[#allocation10 + $0x1c0] sm:$0xff]  ;;  %v874_v38 = vld [vmem:[#allocation8 + $0x1b8] sm:$0xff]  ;;  %v873_v40 = vld [vmem:[#allocation8 + $0x1b0] sm:$0xff] }
  0xd1   : > { %920 = vmatpush1.msra.mxu0 %v825_v56  ;;  %1073 = vmatpush1.msra.mxu1 %v978_v57  ;;  %v1027_v39 = vld [vmem:[#allocation10 + $0x1b8] sm:$0xff]  ;;  %v1025_v41 = vld [vmem:[#allocation10 + $0x1a8] sm:$0xff]  ;;  %v871_v42 = vld [vmem:[#allocation8 + $0x1a0] sm:$0xff] }
  0xd2   : > { %921 = vmatprep.subr.mxu0 %v824_v58  ;;  %1074 = vmatprep.subr.mxu1 %v977_v59  ;;  %v1024_v43 = vld [vmem:[#allocation10 + $0x1a0] sm:$0xff]  ;;  %v870_v44 = vld [vmem:[#allocation8 + $0x198] sm:$0xff]  ;;  %v869_v46 = vld [vmem:[#allocation8 + $0x190] sm:$0xff] }
  0xd3   : > { %922 = vmatpush1.msra.mxu0 %v823_v60  ;;  %1075 = vmatpush1.msra.mxu1 %v976_v61  ;;  %v1023_v45 = vld [vmem:[#allocation10 + $0x198] sm:$0xff]  ;;  %v1022_v47 = vld [vmem:[#allocation10 + $0x190] sm:$0xff]  ;;  %v868_v48 = vld [vmem:[#allocation8 + $0x188] sm:$0xff] }
  0xd4   : > { %923 = vmatprep.subr.mxu0 %v822_v62  ;;  %1076 = vmatprep.subr.mxu1 %v975_v63  ;;  %v1021_v49 = vld [vmem:[#allocation10 + $0x188] sm:$0xff]  ;;  %v867_v50 = vld [vmem:[#allocation8 + $0x180] sm:$0xff]  ;;  %v866_v52 = vld [vmem:[#allocation8 + $0x178] sm:$0xff] }
  0xd5   : > { %924 = vmatpush1.msra.mxu0 %v821_v3  ;;  %1077 = vmatpush1.msra.mxu1 %v974_v5  ;;  %v1020_v51 = vld [vmem:[#allocation10 + $0x180] sm:$0xff]  ;;  %v1019_v53 = vld [vmem:[#allocation10 + $0x178] sm:$0xff]  ;;  %v865_v54 = vld [vmem:[#allocation8 + $0x170] sm:$0xff] }
  0xd6   : > { %925 = vmatprep.subr.mxu0 %v820_v6  ;;  %1078 = vmatprep.subr.mxu1 %v973_v7  ;;  %v1018_v55 = vld [vmem:[#allocation10 + $0x170] sm:$0xff]  ;;  %v864_v56 = vld [vmem:[#allocation8 + $0x168] sm:$0xff]  ;;  %v863_v58 = vld [vmem:[#allocation8 + $0x160] sm:$0xff] }
  0xd7   : > { %926 = vmatpush1.msra.mxu0 %v819_v8  ;;  %1079 = vmatpush1.msra.mxu1 %v972_v9  ;;  %v1017_v57 = vld [vmem:[#allocation10 + $0x168] sm:$0xff]  ;;  %v1016_v59 = vld [vmem:[#allocation10 + $0x160] sm:$0xff]  ;;  %v862_v60 = vld [vmem:[#allocation8 + $0x158] sm:$0xff] }
  0xd8   : > { %927 = vmatprep.subr.mxu0 %v882_v10  ;;  %1080 = vmatprep.subr.mxu1 %v1035_v11  ;;  %v1015_v61 = vld [vmem:[#allocation10 + $0x158] sm:$0xff]  ;;  %v861_v62 = vld [vmem:[#allocation8 + $0x150] sm:$0xff]  ;;  %v860_v3 = vld [vmem:[#allocation8 + $0x148] sm:$0xff] }
  0xd9   : > { %928 = vmatpush2.msra.mxu0 %v881_v12  ;;  %1081 = vmatpush2.msra.mxu1 %v1034_v13  ;;  %v1014_v63 = vld [vmem:[#allocation10 + $0x150] sm:$0xff]  ;;  %v1013_v5 = vld [vmem:[#allocation10 + $0x148] sm:$0xff]  ;;  %v859_v6 = vld [vmem:[#allocation8 + $0x140] sm:$0xff] }
  0xda   : > { %929 = vmatprep.subr.mxu0 %v880_v14  ;;  %1082 = vmatprep.subr.mxu1 %v1033_v15  ;;  %v1012_v7 = vld [vmem:[#allocation10 + $0x140] sm:$0xff]  ;;  %v858_v8 = vld [vmem:[#allocation8 + $0x138] sm:$0xff]  ;;  %v857_v10 = vld [vmem:[#allocation8 + $0x130] sm:$0xff] }
  0xdb   : > { %930 = vmatpush2.msra.mxu0 %v879_v16  ;;  %1083 = vmatpush2.msra.mxu1 %v1032_v17  ;;  %v1011_v9 = vld [vmem:[#allocation10 + $0x138] sm:$0xff]  ;;  %v1010_v11 = vld [vmem:[#allocation10 + $0x130] sm:$0xff]  ;;  %v856_v12 = vld [vmem:[#allocation8 + $0x128] sm:$0xff] }
  0xdc   : > { %931 = vmatprep.subr.mxu0 %v878_v18  ;;  %1084 = vmatprep.subr.mxu1 %v1031_v19  ;;  %v1009_v13 = vld [vmem:[#allocation10 + $0x128] sm:$0xff]  ;;  %v855_v14 = vld [vmem:[#allocation8 + $0x120] sm:$0xff]  ;;  %v854_v16 = vld [vmem:[#allocation8 + $0x118] sm:$0xff] }
  0xdd   : > { %932 = vmatpush2.msra.mxu0 %v877_v20  ;;  %1085 = vmatpush2.msra.mxu1 %v1030_v21  ;;  %v1008_v15 = vld [vmem:[#allocation10 + $0x120] sm:$0xff]  ;;  %v1007_v17 = vld [vmem:[#allocation10 + $0x118] sm:$0xff]  ;;  %v853_v18 = vld [vmem:[#allocation8 + $0x110] sm:$0xff] }
  0xde   : > { %933 = vmatprep.subr.mxu0 %v876_v22  ;;  %1086 = vmatprep.subr.mxu1 %v1029_v23  ;;  %v1006_v19 = vld [vmem:[#allocation10 + $0x110] sm:$0xff]  ;;  %v852_v20 = vld [vmem:[#allocation8 + $0x108] sm:$0xff]  ;;  %v851_v22 = vld [vmem:[#allocation8 + $0x100] sm:$0xff] }
  0xdf   : > { %934 = vmatpush2.msra.mxu0 %v875_v24  ;;  %1087 = vmatpush2.msra.mxu1 %v1028_v25  ;;  %v1005_v21 = vld [vmem:[#allocation10 + $0x108] sm:$0xff]  ;;  %v1004_v23 = vld [vmem:[#allocation10 + $0x100] sm:$0xff]  ;;  %v1156_v24 = vld [vmem:[#allocation11 + $0xf8] sm:$0xff] }
  0xe0   : > { %935 = vmatprep.subr.mxu0 %v874_v38  ;;  %1088 = vmatprep.subr.mxu1 %v1027_v39  ;;  %v751_v38 = vld [vmem:[%s3583_s9] sm:$0x3] }
  0xe1   : > { %936 = vmatpush2.msra.mxu0 %v873_v40 }
 0x140   : > { %v754_v26 = vpop.xlane.xlu0 %753 }
 0x141   : > { %v759_v27 = vmul.f32 0.00390625, %v754_v26 }
 0x143   : > { %v3094_v28 = vsub.f32 %v3081_v0, %v759_v27  ;;  %v3097_v29 = vsub.f32 %v3083_v1, %v759_v27 }
 0x144   : > { %v757_v30 = vpop.xlane.xlu0 %756 }
 0x145   : > { %v760_v31 = vmul.f32 0.00390625, %v757_v30  ;;  %v765_v32 = vmul.f32 %v3094_v28, %v3094_v28  ;;  %v766_v33 = vmul.f32 %v3097_v29, %v3097_v29 }
 0x147   : > { %v3104_v34 = vsub.f32 %v3085_v2, %v760_v31  ;;  %v3107_v35 = vsub.f32 %v3089_v4, %v760_v31  ;;  %v769_v36 = vadd.f32 %v766_v33, %v765_v32  ;;  %v1026_v2 = vld [vmem:[#allocation10 + $0x1b0] sm:$0xff]  ;;  %v872_v4 = vld [vmem:[#allocation8 + $0x1a8] sm:$0xff]  ;;  %v786_v32 = vlaneseq }
 0x148   : > { %1089 = vmatpush2.msra.mxu1 %v1026_v2  ;;  %937 = vmatprep.subr.mxu0 %v872_v4 }
 0x149   : > { %770 = vadd.xlane.f32.xlu1 %v769_v36  ;;  %v767_v0 = vmul.f32 %v3104_v34, %v3104_v34  ;;  %v768_v1 = vmul.f32 %v3107_v35, %v3107_v35  ;;  %1090 = vmatprep.subr.mxu1 %v1025_v41  ;;  %v787_v36 = vshrl.u32 %v786_v32, 7  ;;  %v1180_v32 = vld [vmem:[#allocation11 + $0x1b8] sm:$0xff] }
 0x14a   : > { %938 = vmatpush2.msra.mxu0 %v871_v42  ;;  %1091 = vmatpush2.msra.mxu1 %v1024_v43 }
 0x14b   : > { %v772_v37 = vadd.f32 %v768_v1, %v767_v0  ;;  %939 = vmatprep.subr.mxu0 %v870_v44  ;;  %1092 = vmatprep.subr.mxu1 %v1023_v45  ;;  %v3113_v0 = vsub.s32 1, %v787_v36  ;;  %v3115_v1 = vsub.s32 0, %v787_v36  ;;  %v1178_v36 = vld [vmem:[#allocation11 + $0x1a8] sm:$0xff] }
 0x14c   : > { %940 = vmatpush2.msra.mxu0 %v869_v46  ;;  %1093 = vmatpush2.msra.mxu1 %v1022_v47 }
 0x14d   : > { %773 = vadd.xlane.f32.xlu1 %v772_v37  ;;  %941 = vmatprep.subr.mxu0 %v868_v48  ;;  %v750_v37 = vld [vmem:[%s3582_s28] sm:$0x3]  ;;  %v808_v41 = vrot.slane %v751_v38, %v3113_v0  ;;  %v804_v43 = vrot.slane %v751_v38, %v3115_v1  ;;  %v1176_v38 = vld [vmem:[#allocation11 + $0x198] sm:$0xff] }
 0x14e   : > { %1094 = vmatprep.subr.mxu1 %v1021_v49  ;;  %942 = vmatpush2.msra.mxu0 %v867_v50  ;;  %v793_v39 = vrot.slane %v750_v37, %v3113_v0  ;;  %v789_v40 = vrot.slane %v750_v37, %v3115_v1  ;;  %v1177_v37 = vld [vmem:[#allocation11 + $0x1a0] sm:$0xff] }
 0x14f   : > { %1095 = vmatpush2.msra.mxu1 %v1020_v51  ;;  %943 = vmatprep.subr.mxu0 %v866_v52  ;;  %v1155_v51 = vld [vmem:[#allocation11 + $0xf0] sm:$0xff] }
 0x150   : > { %1096 = vmatprep.subr.mxu1 %v1019_v53  ;;  %944 = vmatpush2.msra.mxu0 %v865_v54  ;;  %v1152_v54 = vld [vmem:[#allocation11 + $0xd8] sm:$0xff] }
 0x151   : > { %1097 = vmatpush2.msra.mxu1 %v1018_v55  ;;  %945 = vmatprep.subr.mxu0 %v864_v56  ;;  %v1151_v55 = vld [vmem:[#allocation11 + $0xd0] sm:$0xff]  ;;  %v1150_v56 = vld [vmem:[#allocation11 + $0xc8] sm:$0xff] }
 0x152   : > { %1098 = vmatprep.subr.mxu1 %v1017_v57  ;;  %946 = vmatpush2.msra.mxu0 %v863_v58  ;;  %v1149_v57 = vld [vmem:[#allocation11 + $0xc0] sm:$0xff]  ;;  %v1148_v58 = vld [vmem:[#allocation11 + $0xb8] sm:$0xff] }
 0x153   : > { %1099 = vmatpush2.msra.mxu1 %v1016_v59  ;;  %947 = vmatprep.subr.mxu0 %v862_v60  ;;  %v1147_v59 = vld [vmem:[#allocation11 + $0xb0] sm:$0xff]  ;;  %v1146_v60 = vld [vmem:[#allocation11 + $0xa8] sm:$0xff] }
 0x154   : > { %1100 = vmatprep.subr.mxu1 %v1015_v61  ;;  %948 = vmatpush2.msra.mxu0 %v861_v62  ;;  %v1145_v61 = vld [vmem:[#allocation11 + $0xa0] sm:$0xff]  ;;  %v1144_v62 = vld [vmem:[#allocation11 + $0x98] sm:$0xff] }
 0x155   : > { %1101 = vmatpush2.msra.mxu1 %v1014_v63  ;;  %949 = vmatprep.subr.mxu0 %v860_v3  ;;  %v1143_v63 = vld [vmem:[#allocation11 + $0x90] sm:$0xff]  ;;  %v1142_v3 = vld [vmem:[#allocation11 + $0x88] sm:$0xff] }
 0x156   : > { %1102 = vmatprep.subr.mxu1 %v1013_v5  ;;  %950 = vmatpush2.msra.mxu0 %v859_v6  ;;  %v1141_v5 = vld [vmem:[#allocation11 + $0x80] sm:$0xff]  ;;  %v1140_v6 = vld [vmem:[#allocation11 + $0x78] sm:$0xff] }
 0x157   : > { %1103 = vmatpush2.msra.mxu1 %v1012_v7  ;;  %951 = vmatprep.subr.mxu0 %v858_v8  ;;  %v1139_v7 = vld [vmem:[#allocation11 + $0x70] sm:$0xff]  ;;  %v1138_v8 = vld [vmem:[#allocation11 + $0x68] sm:$0xff] }
 0x158   : > { %1104 = vmatprep.subr.mxu1 %v1011_v9  ;;  %952 = vmatpush2.msra.mxu0 %v857_v10  ;;  %v1137_v9 = vld [vmem:[#allocation11 + $0x60] sm:$0xff]  ;;  %v1136_v10 = vld [vmem:[#allocation11 + $0x58] sm:$0xff] }
 0x159   : > { %1105 = vmatpush2.msra.mxu1 %v1010_v11  ;;  %953 = vmatprep.subr.mxu0 %v856_v12  ;;  %v1135_v11 = vld [vmem:[#allocation11 + $0x50] sm:$0xff]  ;;  %v1134_v12 = vld [vmem:[#allocation11 + $0x48] sm:$0xff] }
 0x15a   : > { %1106 = vmatprep.subr.mxu1 %v1009_v13  ;;  %954 = vmatpush2.msra.mxu0 %v855_v14  ;;  %v1133_v13 = vld [vmem:[#allocation11 + $0x40] sm:$0xff]  ;;  %v1132_v14 = vld [vmem:[#allocation11 + $0x38] sm:$0xff] }
 0x15b   : > { %1107 = vmatpush2.msra.mxu1 %v1008_v15  ;;  %955 = vmatprep.subr.mxu0 %v854_v16  ;;  %v1131_v15 = vld [vmem:[#allocation11 + $0x30] sm:$0xff]  ;;  %v1130_v16 = vld [vmem:[#allocation11 + $0x28] sm:$0xff] }
 0x15c   : > { %1108 = vmatprep.subr.mxu1 %v1007_v17  ;;  %956 = vmatpush2.msra.mxu0 %v853_v18  ;;  %v1129_v17 = vld [vmem:[#allocation11 + $0x20] sm:$0xff]  ;;  %v1128_v18 = vld [vmem:[#allocation11 + $0x18] sm:$0xff] }
 0x15d   : > { %1109 = vmatpush2.msra.mxu1 %v1006_v19  ;;  %957 = vmatprep.subr.mxu0 %v852_v20  ;;  %v1127_v19 = vld [vmem:[#allocation11 + $0x10] sm:$0xff]  ;;  %v1126_v20 = vld [vmem:[#allocation11 + $0x8] sm:$0xff] }
 0x15e   : > { %1110 = vmatprep.subr.mxu1 %v1005_v21  ;;  %958 = vmatpush2.msra.mxu0 %v851_v22  ;;  %v1125_v21 = vld [vmem:[#allocation11] sm:$0xff]  ;;  %v1188_v22 = vld [vmem:[#allocation11 + $0x1f8] sm:$0xff] }
 0x15f   : > { %1111 = vmatpush2.msra.mxu1 %v1004_v23  ;;  %1201 = vmatprep.subr.mxu0 %v1156_v24  ;;  %v1187_v23 = vld [vmem:[#allocation11 + $0x1f0] sm:$0xff] }
 0x160   : > { %2026 = vmatprep.subr.mxu1 %v1156_v24  ;;  %v1186_v24 = vld [vmem:[#allocation11 + $0x1e8] sm:$0xff] }
 0x1d2   : > { %v771_v25 = vpop.xlane.xlu1 %770 }
 0x1d3   : > { %v775_v26 = vmul.f32 0.00390625, %v771_v25  ;;  %v1185_v25 = vld [vmem:[#allocation11 + $0x1e0] sm:$0xff] }
 0x1d5   : > { %v777_v27 = vadd.f32 1e-05, %v775_v26  ;;  %v1184_v26 = vld [vmem:[#allocation11 + $0x1d8] sm:$0xff] }
 0x1d6   : > { %v774_v30 = vpop.xlane.xlu1 %773 }
 0x1d7   : > { %2302 = vrsqrt.f32 %v777_v27  ;;  %v776_v31 = vmul.f32 0.00390625, %v774_v30  ;;  %v1183_v27 = vld [vmem:[#allocation11 + $0x1d0] sm:$0xff]  ;;  %v1182_v30 = vld [vmem:[#allocation11 + $0x1c8] sm:$0xff] }
 0x1d9   : > { %v778_v33 = vadd.f32 1e-05, %v776_v31  ;;  %v1181_v31 = vld [vmem:[#allocation11 + $0x1c0] sm:$0xff] }
 0x1db   : > { %2304 = vrsqrt.f32 %v778_v33  ;;  %v1179_v33 = vld [vmem:[#allocation11 + $0x1b0] sm:$0xff] }
 0x1e4   : > { %v2303_v2 = vpop.eup %2302 }
 0x1e5   : > { %v782_v4 = vmul.f32 %v2303_v2, %v3097_v29  ;;  %v781_v42 = vmul.f32 %v2303_v2, %v3094_v28  ;;  %v1154_v28 = vld [vmem:[#allocation11 + $0xe8] sm:$0xff]  ;;  %v1173_v2 = vld [vmem:[#allocation11 + $0x180] sm:$0xff] }
 0x1e7   : > { %v797_v44 = vmul.f32 %v793_v39, %v782_v4  ;;  %v796_v45 = vmul.f32 %v789_v40, %v781_v42  ;;  %v1172_v4 = vld [vmem:[#allocation11 + $0x178] sm:$0xff]  ;;  %v1170_v42 = vld [vmem:[#allocation11 + $0x168] sm:$0xff] }
 0x1e8   : > { %v2305_v46 = vpop.eup %2304 }
 0x1e9   : > { %v812_v47 = vadd.f32 %v808_v41, %v797_v44  ;;  %v3129_v48 = vadd.f32 %v804_v43, %v796_v45  ;;  %v784_v49 = vmul.f32 %v2305_v46, %v3107_v35  ;;  %v783_v50 = vmul.f32 %v2305_v46, %v3104_v34  ;;  %v1153_v34 = vld [vmem:[#allocation11 + $0xe0] sm:$0xff]  ;;  %v1168_v44 = vld [vmem:[#allocation11 + $0x158] sm:$0xff]  ;;  %v1167_v45 = vld [vmem:[#allocation11 + $0x150] sm:$0xff] }
 0x1ea   : > { %v1166_v46 = vld [vmem:[#allocation11 + $0x148] sm:$0xff] }
 0x1eb   : > { %816 = vst [vmem:[%s3134_s18 + $0x8] sm:$0xff] %v812_v47  ;;  %959 = vmatprep.mubr.f32.mxu0 %v812_v47  ;;  %1112 = vmatprep.mubr.f32.mxu1 %v812_v47  ;;  %815 = vst [vmem:[%s3134_s18] sm:$0xff] %v3129_v48  ;;  %v799_v29 = vmul.f32 %v793_v39, %v784_v49  ;;  %v798_v52 = vmul.f32 %v789_v40, %v783_v50  ;;  %v1175_v39 = vld [vmem:[#allocation11 + $0x190] sm:$0xff]  ;;  %v1174_v40 = vld [vmem:[#allocation11 + $0x188] sm:$0xff] }
 0x1ec   : > { %960 = vmatmul.mubr.f32.vlgmr.msra.gmra.mxu0 %v3129_v48  ;;  %1113 = vmatmul.mubr.f32.vlgmr.msra.gmra.mxu1 %v3129_v48  ;;  %v1164_v49 = vld [vmem:[#allocation11 + $0x138] sm:$0xff]  ;;  %v1163_v50 = vld [vmem:[#allocation11 + $0x130] sm:$0xff] }
 0x1ed   : > { %1202 = vmatpush1.msra.mxu0 %v1155_v51  ;;  %2058 = vmatpush1.msra.mxu1 %v1155_v51  ;;  %v814_v35 = vadd.f32 %v808_v41, %v799_v29  ;;  %v3141_v53 = vadd.f32 %v804_v43, %v798_v52  ;;  %v1171_v41 = vld [vmem:[#allocation11 + $0x170] sm:$0xff]  ;;  %v1169_v43 = vld [vmem:[#allocation11 + $0x160] sm:$0xff]  ;;  %v1162_v51 = vld [vmem:[#allocation11 + $0x128] sm:$0xff] }
 0x1ee   : > { %1203 = vmatprep.subr.mxu0 %v1154_v28  ;;  %2027 = vmatprep.subr.mxu1 %v1154_v28  ;;  %v1161_v28 = vld [vmem:[#allocation11 + $0x120] sm:$0xff]  ;;  %v1160_v29 = vld [vmem:[#allocation11 + $0x118] sm:$0xff]  ;;  %v1159_v52 = vld [vmem:[#allocation11 + $0x110] sm:$0xff] }
 0x1ef   : > { %1204 = vmatpush1.msra.mxu0 %v1153_v34  ;;  %2059 = vmatpush1.msra.mxu1 %v1153_v34  ;;  %818 = vst [vmem:[%s3134_s18 + $0x18] sm:$0xff] %v814_v35  ;;  %817 = vst [vmem:[%s3134_s18 + $0x10] sm:$0xff] %v3141_v53  ;;  %v1158_v34 = vld [vmem:[#allocation11 + $0x108] sm:$0xff]  ;;  %s2675_s18 = smov [#allocation13]  }
 0x1f0   : > { %965 = vmatprep.mubr.f32.mxu0 %v814_v35  ;;  %1118 = vmatprep.mubr.f32.mxu1 %v814_v35 }
 0x1f1   : > { %1205 = vmatprep.subr.mxu0 %v1152_v54  ;;  %2028 = vmatprep.subr.mxu1 %v1152_v54  ;;  %v883_v54 = vld [vmem:[%s3584_s6] sm:$0x3] }
 0x1f2   : > { %966 = vmatmul.mubr.f32.gmra.mxu0 %v3141_v53  ;;  %1119 = vmatmul.mubr.f32.gmra.mxu1 %v3141_v53 }
 0x1f3   : > { %1206 = vmatpush1.msra.mxu0 %v1151_v55  ;;  %2060 = vmatpush1.msra.mxu1 %v1151_v55  ;;  %v1036_v55 = vld [vmem:[%s3585_s3] sm:$0x3]  ;;  %s1405_s3 = scalar_lea.sflag [#allocation4], %s3049_s23 }
 0x1f4   : > { %1207 = vmatprep.subr.mxu0 %v1150_v56  ;;  %2029 = vmatprep.subr.mxu1 %v1150_v56  ;;  %v888_v56 = vrot.slane %v883_v54, %v3115_v1 }
 0x1f5   : > { %1265 = vmatprep.mubr.f32.mxu0 %v812_v47  ;;  %1271 = vmatprep.mubr.f32.mxu1 %v814_v35  ;;  %v1165_v47 = vld [vmem:[#allocation11 + $0x140] sm:$0xff] }
 0x1f6   : > { %1208 = vmatpush1.msra.mxu0 %v1149_v57  ;;  %2061 = vmatpush1.msra.mxu1 %v1149_v57  ;;  %v1157_v35 = vld [vmem:[#allocation11 + $0x100] sm:$0xff]  ;;  %v1041_v57 = vrot.slane %v1036_v55, %v3115_v1 }
 0x1f7   : > { %1209 = vmatprep.subr.mxu0 %v1148_v58  ;;  %2030 = vmatprep.subr.mxu1 %v1148_v58 }
 0x1f8   : > { %1210 = vmatpush1.msra.mxu0 %v1147_v59  ;;  %2062 = vmatpush1.msra.mxu1 %v1147_v59  ;;  %v892_v59 = vrot.slane %v883_v54, %v3113_v0 }
 0x1f9   : > { %1211 = vmatprep.subr.mxu0 %v1146_v60  ;;  %2031 = vmatprep.subr.mxu1 %v1146_v60 }
 0x1fa   : > { %1212 = vmatpush1.msra.mxu0 %v1145_v61  ;;  %2063 = vmatpush1.msra.mxu1 %v1145_v61 }
 0x1fb   : > { %1213 = vmatprep.subr.mxu0 %v1144_v62  ;;  %2032 = vmatprep.subr.mxu1 %v1144_v62  ;;  %v1286_v62 = vld [vmem:[%s3065_s8] sm:$0xff] }
 0x1fc   : > { %1214 = vmatpush1.msra.mxu0 %v1143_v63  ;;  %2064 = vmatpush1.msra.mxu1 %v1143_v63  ;;  %v1291_v63 = vld [vmem:[%s3071_s13 + $0x8] sm:$0xff] }
 0x1fd   : > { %1215 = vmatprep.subr.mxu0 %v1142_v3  ;;  %2033 = vmatprep.subr.mxu1 %v1142_v3 }
 0x1fe   : > { %1216 = vmatpush1.msra.mxu0 %v1141_v5  ;;  %2065 = vmatpush1.msra.mxu1 %v1141_v5 }
 0x1ff   : > { %1217 = vmatprep.subr.mxu0 %v1140_v6  ;;  %2034 = vmatprep.subr.mxu1 %v1140_v6  ;;  %v1287_v6 = vld [vmem:[%s3065_s8 + $0x8] sm:$0xff] }
 0x200   : > { %1218 = vmatpush1.msra.mxu0 %v1139_v7  ;;  %2066 = vmatpush1.msra.mxu1 %v1139_v7  ;;  %v1290_v7 = vld [vmem:[%s3071_s13] sm:$0xff] }
 0x201   : > { %1219 = vmatprep.subr.mxu0 %v1138_v8  ;;  %2035 = vmatprep.subr.mxu1 %v1138_v8 }
 0x202   : > { %1220 = vmatpush1.msra.mxu0 %v1137_v9  ;;  %2067 = vmatpush1.msra.mxu1 %v1137_v9 }
 0x203   : > { %1221 = vmatprep.subr.mxu0 %v1136_v10  ;;  %2036 = vmatprep.subr.mxu1 %v1136_v10 }
 0x204   : > { %1222 = vmatpush1.msra.mxu0 %v1135_v11  ;;  %2068 = vmatpush1.msra.mxu1 %v1135_v11 }
 0x205   : > { %1223 = vmatprep.subr.mxu0 %v1134_v12  ;;  %2037 = vmatprep.subr.mxu1 %v1134_v12 }
 0x206   : > { %1224 = vmatpush1.msra.mxu0 %v1133_v13  ;;  %2069 = vmatpush1.msra.mxu1 %v1133_v13 }
 0x207   : > { %1225 = vmatprep.subr.mxu0 %v1132_v14  ;;  %2038 = vmatprep.subr.mxu1 %v1132_v14 }
 0x208   : > { %1226 = vmatpush1.msra.mxu0 %v1131_v15  ;;  %2070 = vmatpush1.msra.mxu1 %v1131_v15 }
 0x209   : > { %1227 = vmatprep.subr.mxu0 %v1130_v16  ;;  %2039 = vmatprep.subr.mxu1 %v1130_v16 }
 0x20a   : > { %1228 = vmatpush1.msra.mxu0 %v1129_v17  ;;  %2071 = vmatpush1.msra.mxu1 %v1129_v17 }
 0x20b   : > { %1229 = vmatprep.subr.mxu0 %v1128_v18  ;;  %2040 = vmatprep.subr.mxu1 %v1128_v18 }
 0x20c   : > { %1230 = vmatpush1.msra.mxu0 %v1127_v19  ;;  %2072 = vmatpush1.msra.mxu1 %v1127_v19 }
 0x20d   : > { %1231 = vmatprep.subr.mxu0 %v1126_v20  ;;  %2041 = vmatprep.subr.mxu1 %v1126_v20 }
 0x20e   : > { %1232 = vmatpush1.msra.mxu0 %v1125_v21  ;;  %2073 = vmatpush1.msra.mxu1 %v1125_v21 }
 0x20f   : > { %1233 = vmatprep.subr.mxu0 %v1188_v22  ;;  %2042 = vmatprep.subr.mxu1 %v1188_v22  ;;  %v1288_v22 = vld [vmem:[%s3065_s8 + $0x10] sm:$0xff] }
 0x210   : > { %1234 = vmatpush2.msra.mxu0 %v1187_v23  ;;  %2074 = vmatpush2.msra.mxu1 %v1187_v23  ;;  %v1293_v23 = vld [vmem:[%s3071_s13 + $0x18] sm:$0xff] }
 0x211   : > { %1235 = vmatprep.subr.mxu0 %v1186_v24  ;;  %2043 = vmatprep.subr.mxu1 %v1186_v24 }
 0x212   : > { %1236 = vmatpush2.msra.mxu0 %v1185_v25  ;;  %2075 = vmatpush2.msra.mxu1 %v1185_v25 }
 0x213   : > { %1237 = vmatprep.subr.mxu0 %v1184_v26  ;;  %2044 = vmatprep.subr.mxu1 %v1184_v26 }
 0x214   : > { %1238 = vmatpush2.msra.mxu0 %v1183_v27  ;;  %2076 = vmatpush2.msra.mxu1 %v1183_v27 }
 0x215   : > { %1239 = vmatprep.subr.mxu0 %v1182_v30  ;;  %2045 = vmatprep.subr.mxu1 %v1182_v30 }
 0x216   : > { %1240 = vmatpush2.msra.mxu0 %v1181_v31  ;;  %2077 = vmatpush2.msra.mxu1 %v1181_v31 }
 0x217   : > { %1241 = vmatprep.subr.mxu0 %v1180_v32  ;;  %2046 = vmatprep.subr.mxu1 %v1180_v32  ;;  %v1289_v32 = vld [vmem:[%s3065_s8 + $0x18] sm:$0xff]  ;;  %s3588_s8 = sld [smem:[#allocation46_spill]] }
 0x218   : > { %1242 = vmatpush2.msra.mxu0 %v1179_v33  ;;  %2078 = vmatpush2.msra.mxu1 %v1179_v33  ;;  %v1292_v33 = vld [vmem:[%s3071_s13 + $0x10] sm:$0xff]  ;;  %s2023_s13 = sshll.u32 %s3586_s22, 2 }
 0x219   : > { %1243 = vmatprep.subr.mxu0 %v1178_v36  ;;  %2047 = vmatprep.subr.mxu1 %v1178_v36  ;;  %s1443_s19 = sadd.s32 %s2023_s13, %s1997_s17  ;;  %s2468_s13 = scalar_lea.vmem %s3222_s2, 512 }
 0x21a   : > { %1244 = vmatpush2.msra.mxu0 %v1177_v37  ;;  %2079 = vmatpush2.msra.mxu1 %v1177_v37  ;;  %s3210_s28 = sshll.u32 %s1443_s19, 7  ;;  %p2469_p12 = scmp.ne.s32.totalorder %s3222_s2, %s2468_s13 }
 0x21b   : > { %1245 = vmatprep.subr.mxu0 %v1176_v38  ;;  %2048 = vmatprep.subr.mxu1 %v1176_v38  ;;  %s3217_s11 = scalar_lea.hbm %s3589_s16, %s3210_s28  ;;  %s2472_s17 = sshll.u32 %s2675_s18, 4  ;;  %s2473_s17 = int_to_ptr.vmem [resolvable:$false] %s2472_s17 }
 0x21c   : > { %1246 = vmatpush2.msra.mxu0 %v1175_v39  ;;  %2080 = vmatpush2.msra.mxu1 %v1175_v39  ;;  %s2474_s19 = scalar_lea.vmem %s2473_s17, 1024  ;;  %p2475_p9 = scmp.lt.s32.totalorder %s3222_s2, %s2473_s17 }
 0x21d   : > { %1247 = vmatprep.subr.mxu0 %v1174_v40  ;;  %2049 = vmatprep.subr.mxu1 %v1174_v40  ;;  %p3591_p1 = scmp.ne.s32.totalorder %s3588_s8, 0  ;;  %p2476_p5 = scmp.lt.s32.totalorder %s2474_s19, %s2468_s13 }
 0x21e   : > { %1248 = vmatpush2.msra.mxu0 %v1173_v2  ;;  %2081 = vmatpush2.msra.mxu1 %v1173_v2 }
 0x21f   : > { %1249 = vmatprep.subr.mxu0 %v1172_v4  ;;  %2050 = vmatprep.subr.mxu1 %v1172_v4  ;;  %p2470_p8 = pnand %p2469_p12, %p3591_p1  ;;  %p2477_p6 = por %p2476_p5, %p2475_p9 }
 0x220   : > { %1250 = vmatpush2.msra.mxu0 %v1171_v41  ;;  %2082 = vmatpush2.msra.mxu1 %v1171_v41 }
 0x221   : > { %1251 = vmatprep.subr.mxu0 %v1170_v42  ;;  %2051 = vmatprep.subr.mxu1 %v1170_v42  ;;  %p2471_p3 = pneg %p2470_p8 }
 0x222   : > { %1252 = vmatpush2.msra.mxu0 %v1169_v43  ;;  %2083 = vmatpush2.msra.mxu1 %v1169_v43 }
 0x223   : > { %1253 = vmatprep.subr.mxu0 %v1168_v44  ;;  %2052 = vmatprep.subr.mxu1 %v1168_v44  ;;  %p2478_p0 = pnand %p2477_p6, %p2471_p3 }
 0x224   : > { %1254 = vmatpush2.msra.mxu0 %v1167_v45  ;;  %2084 = vmatpush2.msra.mxu1 %v1167_v45 }
 0x225   : > { %1255 = vmatprep.subr.mxu0 %v1166_v46  ;;  %2053 = vmatprep.subr.mxu1 %v1166_v46 }
 0x226   : > { %1256 = vmatpush2.msra.mxu0 %v1165_v47  ;;  %2085 = vmatpush2.msra.mxu1 %v1165_v47 }
 0x227   : > { %1257 = vmatprep.subr.mxu0 %v1164_v49  ;;  %2054 = vmatprep.subr.mxu1 %v1164_v49 }
 0x228   : > { %1258 = vmatpush2.msra.mxu0 %v1163_v50  ;;  %2086 = vmatpush2.msra.mxu1 %v1163_v50 }
 0x229   : > { %1259 = vmatprep.subr.mxu0 %v1162_v51  ;;  %2055 = vmatprep.subr.mxu1 %v1162_v51 }
 0x22a   : > { %1260 = vmatpush2.msra.mxu0 %v1161_v28  ;;  %2087 = vmatpush2.msra.mxu1 %v1161_v28 }
 0x22b   : > { %1261 = vmatprep.subr.mxu0 %v1160_v29  ;;  %2056 = vmatprep.subr.mxu1 %v1160_v29  ;;  %v1189_v29 = vld [vmem:[%s3590_s15] sm:$0x3] }
 0x22c   : > { %1262 = vmatpush2.msra.mxu0 %v1159_v52  ;;  %2088 = vmatpush2.msra.mxu1 %v1159_v52  ;;  %v1194_v52 = vrot.slane %v1189_v29, %v3115_v1 }
 0x22d   : > { %1263 = vmatprep.subr.mxu0 %v1158_v34  ;;  %2057 = vmatprep.subr.mxu1 %v1158_v34 }
 0x22e   : > { %1264 = vmatpush2.msra.mxu0 %v1157_v35  ;;  %2089 = vmatpush2.msra.mxu1 %v1157_v35 }
 0x22f   : > { %1266 = vmatmul.mubr.f32.vlgmr.msra.gmra.mxu0 %v3129_v48  ;;  %1272 = vmatmul.mubr.f32.vlgmr.msra.gmra.mxu1 %v3141_v53  ;;  %v1045_v53 = vrot.slane %v1036_v55, %v3113_v0 }
 0x2ac   : > { %v961_v58 = vpop.f32.mrf.mxu0  ;;  %v1114_v48 = vpop.f32.mrf.mxu1 }
 0x2ad   : > { %v962_v60 = vadd.f32 %v961_v58, %v888_v56  ;;  %v1115_v61 = vadd.f32 %v1114_v48, %v1041_v57 }
 0x2ae   : > { %v963_v3 = vpop.f32.mrf.mxu0  ;;  %v1116_v5 = vpop.f32.mrf.mxu1 }
 0x2af   : > { %1278 = vst [vmem:[%s3163_s1] sm:$0xff] %v1115_v61  ;;  %v964_v8 = vadd.f32 %v963_v3, %v892_v59  ;;  %v1117_v9 = vadd.f32 %v1116_v5, %v1045_v53  ;;  %v1294_v10 = vmul.f32 %v1286_v62, %v962_v60  ;;  %v1299_v11 = vmul.f32 %v1291_v63, %v962_v60 }
 0x2b0   : > { %v1310_v12 = vmul.f32 %v1286_v62, %v1115_v61  ;;  %v1315_v13 = vmul.f32 %v1291_v63, %v1115_v61 }
 0x2b1   : > { %v1295_v14 = vmul.f32 %v1287_v6, %v964_v8  ;;  %v1298_v15 = vmul.f32 %v1290_v7, %v964_v8  ;;  %1279 = vst [vmem:[%s3163_s1 + $0x8] sm:$0xff] %v1117_v9  ;;  %v1311_v16 = vmul.f32 %v1287_v6, %v1117_v9  ;;  %v1314_v17 = vmul.f32 %v1290_v7, %v1117_v9 }
 0x2b2   : > { %v967_v18 = vpop.f32.mrf.mxu0  ;;  %v1120_v19 = vpop.f32.mrf.mxu1 }
 0x2b3   : > { %v968_v20 = vadd.f32 %v967_v18, %v888_v56  ;;  %v1121_v21 = vadd.f32 %v1120_v19, %v1041_v57  ;;  %v1319_v26 = vadd.f32 %v1315_v13, %v1311_v16  ;;  %v1318_v27 = vadd.f32 %v1314_v17, %v1310_v12 }
 0x2b4   : > { %v969_v24 = vpop.f32.mrf.mxu0  ;;  %v1122_v25 = vpop.f32.mrf.mxu1  ;;  %v1302_v30 = vadd.f32 %v1298_v15, %v1294_v10  ;;  %v1303_v31 = vadd.f32 %v1299_v11, %v1295_v14 }
 0x2b5   : > { %1280 = vst [vmem:[%s3163_s1 + $0x10] sm:$0xff] %v1121_v21  ;;  %v970_v36 = vadd.f32 %v969_v24, %v892_v59  ;;  %v1123_v37 = vadd.f32 %v1122_v25, %v1045_v53  ;;  %1384 = vrot.lane.b32.xlu0 %v1319_v26, %s2674_s7  ;;  %1979 = vst.msk [vmem:[%s3179_s21 + $0x20] sm:$0xff] %vm1322_vm0, %v1319_v26  ;;  %1342 = vrot.lane.b32.xlu1 %v1318_v27, %s2674_s7 }
 0x2b6   : > { %1325 = vst.msk [vmem:[%s3179_s21] sm:$0xff] %vm1322_vm0, %v1318_v27  ;;  %v1306_v38 = vmul.f32 0.125, %v1302_v30  ;;  %v1307_v39 = vmul.f32 0.125, %v1303_v31  ;;  %v1296_v40 = vmul.f32 %v1288_v22, %v968_v20  ;;  %v1301_v2 = vmul.f32 %v1293_v23, %v968_v20 }
 0x2b7   : > { %v1312_v4 = vmul.f32 %v1288_v22, %v1121_v21  ;;  %v1317_v41 = vmul.f32 %v1293_v23, %v1121_v21  ;;  %v1297_v42 = vmul.f32 %v1289_v32, %v970_v36  ;;  %v1300_v43 = vmul.f32 %v1292_v33, %v970_v36  ;;  %1281 = vst [vmem:[%s3163_s1 + $0x18] sm:$0xff] %v1123_v37 }
 0x2b8   : > { %v1313_v44 = vmul.f32 %v1289_v32, %v1123_v37  ;;  %v1316_v45 = vmul.f32 %v1292_v33, %v1123_v37  ;;  %1323 = vst.msk [vmem:[%s3188_s12] sm:$0xff] %vm1322_vm0, %v1306_v38  ;;  %1977 = vst.msk [vmem:[%s3188_s12 + $0x20] sm:$0xff] %vm1322_vm0, %v1307_v39 }
 0x2b9   : > { %1331 = vrot.lane.b32.xlu0 %v1306_v38, %s2674_s7  ;;  %v1304_v49 = vadd.f32 %v1300_v43, %v1296_v40  ;;  %v1305_v50 = vadd.f32 %v1301_v2, %v1297_v42 }
 0x2ba   : > { %v1320_v46 = vadd.f32 %v1316_v45, %v1312_v4  ;;  %v1321_v47 = vadd.f32 %v1317_v41, %v1313_v44 }
 0x2bb   : > { %v1308_v51 = vmul.f32 0.125, %v1304_v49  ;;  %v1309_v28 = vmul.f32 0.125, %v1305_v50 }
 0x2bc   : > { %1344 = vrot.lane.b32.xlu1 %v1320_v46, %s2674_s7  ;;  %1326 = vst.msk [vmem:[%s3179_s21 + $0x8] sm:$0xff] %vm1322_vm0, %v1320_v46  ;;  %1980 = vst.msk [vmem:[%s3179_s21 + $0x28] sm:$0xff] %vm1322_vm0, %v1321_v47 }
 0x2bd   : > { %1373 = vrot.lane.b32.xlu0 %v1307_v39, %s2674_s7  ;;  %1324 = vst.msk [vmem:[%s3188_s12 + $0x8] sm:$0xff] %vm1322_vm0, %v1308_v51  ;;  %1978 = vst.msk [vmem:[%s3188_s12 + $0x28] sm:$0xff] %vm1322_vm0, %v1309_v28 }
 0x2c0   : > { %1386 = vrot.lane.b32.xlu1 %v1321_v47, %s2674_s7 }
 0x2c4   : > { %1333 = vrot.lane.b32.xlu1 %v1308_v51, %s2674_s7 }
 0x2c8   : > { %1375 = vrot.lane.b32.xlu1 %v1309_v28, %s2674_s7 }
 0x2c9   : > { %2481 = shalt.err (!%p2478_p0)
}
 0x2ca   : > { %s2482_s10 = scalar_lea.hbm %s3217_s11, 512  ;;  %s2486_s27 = scalar_lea.hbm %s3589_s16, 2048 }
 0x2cb   : > { %p2483_p13 = scmp.ne.s32.totalorder %s3217_s11, %s2482_s10  ;;  %p2487_p7 = scmp.lt.s32.totalorder %s3217_s11, %s3589_s16 }
 0x2cc   : > { %p2488_p2 = scmp.lt.s32.totalorder %s2486_s27, %s2482_s10 }
 0x2cd   : > { %p2484_p10 = pnand %p2483_p13, %p3591_p1 }
 0x2ce   : > { %p2489_p11 = por %p2488_p2, %p2487_p7 }
 0x2cf   : > { %p2485_p4 = pneg %p2484_p10 }
 0x2d1   : > { %p2490_p12 = pnand %p2489_p11, %p2485_p4 }
 0x2d3   : > { %2493 = shalt.err (!%p2490_p12)
}
 0x2d4   : > { %s3516_s13 = smov 256   ;;  %s3518_s17 = smov 16   ;;  %v1198_v1 = vrot.slane %v1189_v29, %v3113_v0 }
 0x2d5   : > { %2108 = dma.vmem_to_hbm [thread:$0]  (%p3591_p1), %s3222_s2, 512, %s3217_s11, %s1405_s3, %s3516_s13, %s3516_s13, %s3518_s17  }
 0x2d6   : > { %s3253_s19 = scalar_lea.vmem [#allocation20], %s3052_s20  ;;  %s3257_s10 = scalar_lea.vmem [#allocation17], %s3169_s24 }
 0x2d7   : > { %s1410_s20 = scalar_lea.sflag [#allocation15], %s3061_s14  ;;  %s1420_s24 = scalar_lea.sflag [#allocation18], %s3061_s14 }
 0x2ef   : > { %v1267_v34 = vpop.f32.mrf.mxu0  ;;  %v1273_v35 = vpop.f32.mrf.mxu1 }
 0x2f0   : > { %v1268_v54 = vadd.f32 %v1267_v34, %v1194_v52  ;;  %v1274_v55 = vadd.f32 %v1273_v35, %v1194_v52 }
 0x2f1   : > { %v1269_v56 = vpop.f32.mrf.mxu0  ;;  %v1275_v57 = vpop.f32.mrf.mxu1 }
 0x2f2   : > { %1282 = vst [vmem:[%s3253_s19] sm:$0xff] %v1268_v54  ;;  %1327 = vst.msk [vmem:[%s3257_s10] sm:$0xff] %vm1322_vm0, %v1268_v54  ;;  %v1270_v0 = vadd.f32 %v1269_v56, %v1198_v1  ;;  %v1276_v58 = vadd.f32 %v1275_v57, %v1198_v1  ;;  %1353 = vrot.lane.b32.xlu0 %v1268_v54, %s2674_s7  ;;  %1355 = vrot.lane.b32.xlu1 %v1274_v55, %s2674_s7 }
 0x2f3   : > { %1284 = vst [vmem:[%s3253_s19 + $0x10] sm:$0xff] %v1274_v55  ;;  %1328 = vst.msk [vmem:[%s3257_s10 + $0x8] sm:$0xff] %vm1322_vm0, %v1274_v55 }
 0x2f4   : > { %1283 = vst [vmem:[%s3253_s19 + $0x8] sm:$0xff] %v1270_v0  ;;  %1981 = vst.msk [vmem:[%s3257_s10 + $0x20] sm:$0xff] %vm1322_vm0, %v1270_v0 }
 0x2f5   : > { %1285 = vst [vmem:[%s3253_s19 + $0x18] sm:$0xff] %v1276_v58  ;;  %1982 = vst.msk [vmem:[%s3257_s10 + $0x28] sm:$0xff] %vm1322_vm0, %v1276_v58 }
 0x2f6   : > { %1395 = vrot.lane.b32.xlu0 %v1270_v0, %s2674_s7  ;;  %1397 = vrot.lane.b32.xlu1 %v1276_v58, %s2674_s7 }
 0x327   : > { %v1343_v48 = vpop.permute.xlu1 %1342  ;;  %v1385_v59 = vpop.permute.xlu0 %1384 }
 0x328   : > { %1973 = vst.msk [vmem:[%s3179_s21 + $0x10] sm:$0xff] %vm1322_vm0, %v1343_v48  ;;  %1985 = vst.msk [vmem:[%s3179_s21 + $0x30] sm:$0xff] %vm1322_vm0, %v1385_v59 }
 0x32b   : > { %v1332_v53 = vpop.permute.xlu0 %1331 }
 0x32c   : > { %1971 = vst.msk [vmem:[%s3188_s12 + $0x10] sm:$0xff] %vm1322_vm0, %v1332_v53 }
 0x32e   : > { %v1345_v60 = vpop.permute.xlu1 %1344 }
 0x32f   : > { %1974 = vst.msk [vmem:[%s3179_s21 + $0x18] sm:$0xff] %vm1322_vm0, %v1345_v60  ;;  %v1374_v61 = vpop.permute.xlu0 %1373 }
 0x330   : > { %1983 = vst.msk [vmem:[%s3188_s12 + $0x30] sm:$0xff] %vm1322_vm0, %v1374_v61 }
 0x332   : > { %v1387_v62 = vpop.permute.xlu1 %1386 }
 0x333   : > { %1986 = vst.msk [vmem:[%s3179_s21 + $0x38] sm:$0xff] %vm1322_vm0, %v1387_v62 }
 0x336   : > { %v1334_v63 = vpop.permute.xlu1 %1333 }
 0x337   : > { %1972 = vst.msk [vmem:[%s3188_s12 + $0x18] sm:$0xff] %vm1322_vm0, %v1334_v63 }
 0x33a   : > { %v1376_v3 = vpop.permute.xlu1 %1375 }
 0x33b   : > { %1984 = vst.msk [vmem:[%s3188_s12 + $0x38] sm:$0xff] %vm1322_vm0, %v1376_v3 }
 0x364   : > { %v1356_v5 = vpop.permute.xlu1 %1355  ;;  %v1354_v6 = vpop.permute.xlu0 %1353 }
 0x365   : > { %1976 = vst.msk [vmem:[%s3257_s10 + $0x18] sm:$0xff] %vm1322_vm0, %v1356_v5  ;;  %1975 = vst.msk [vmem:[%s3257_s10 + $0x10] sm:$0xff] %vm1322_vm0, %v1354_v6 }
 0x368   : > { %v1398_v7 = vpop.permute.xlu1 %1397  ;;  %v1396_v8 = vpop.permute.xlu0 %1395 }
 0x369   : > { %1988 = vst.msk [vmem:[%s3257_s10 + $0x38] sm:$0xff] %vm1322_vm0, %v1398_v7  ;;  %1987 = vst.msk [vmem:[%s3257_s10 + $0x30] sm:$0xff] %vm1322_vm0, %v1396_v8 }
 0x36a   : > { %s1999_s2 = sshll.u32 %s3586_s22, 1  ;;  %s2000_s11 = sshll.u32 %s3587_s4, 4 }
 0x36b   : > { %s1461_s3 = sadd.s32 %s2000_s11, %s1999_s2  ;;  %s1474_s9 = sshll.u32 %s3188_s12, 4  ;;  %s1475_s9 = int_to_ptr.vmem [resolvable:$true] %s1474_s9 }
 0x36c   : > { %s3304_s6 = sshll.u32 %s1461_s3, 7  ;;  %s3592_s18 = sld [smem:[#allocation60_spill]] }
 0x36d   : > { %s2678_s13 = smov 256   ;;  %s2679_s17 = smov 512  }
 0x36e   : > { %2109 = sst [smem:[#allocation23]] (%p3591_p1), %s2678_s13  ;;  %s2680_s22 = smov 2  }
 0x36f   : > { %2110 = sst [smem:[#allocation23 + $0x1]] (%p3591_p1), %s2679_s17  ;;  %s2681_s12 = smov 128  }
 0x370   : > { %2111 = sst [smem:[#allocation23 + $0x2]] (%p3591_p1), %s2680_s22  ;;  %s2682_s4 = smov 8  }
 0x371   : > { %2112 = sst [smem:[#allocation23 + $0x3]] (%p3591_p1), %s2681_s12  ;;  %s2683_s2 = smov 131072  }
 0x372   : > { %s1463_s7 = scalar_lea.hbm %s3592_s18, %s3304_s6  ;;  %2113 = sst [smem:[#allocation23 + $0x4]] (%p3591_p1), %s2681_s12 }
 0x373   : > { %2114 = sst [smem:[#allocation23 + $0x5]] (%p3591_p1), %s2682_s4  ;;  %s2684_s11 = smov 0  }
 0x374   : > { %2115 = dma.general (%p3591_p1), %s1475_s9, 1024, %s1463_s7, %s1410_s20, %s2683_s2, [#allocation23], %s2684_s11, 0  }
 0x375   : > { %s3593_s17 = sld [smem:[#allocation61_spill]]  ;;  %s1515_s15 = sshll.u32 %s3179_s21, 4  ;;  %s1516_s15 = int_to_ptr.vmem [resolvable:$true] %s1515_s15 }
 0x376   : > { %s2685_s18 = smov 256   ;;  %s2686_s7 = smov 512  }
 0x377   : > { %2116 = sst [smem:[#allocation25]] (%p3591_p1), %s2685_s18  ;;  %s2687_s9 = smov 2  }
 0x378   : > { %2117 = sst [smem:[#allocation25 + $0x1]] (%p3591_p1), %s2686_s7  ;;  %s2688_s22 = smov 128  }
 0x379   : > { %2118 = sst [smem:[#allocation25 + $0x2]] (%p3591_p1), %s2687_s9  ;;  %s2689_s12 = smov 8  }
 0x37a   : > { %2119 = sst [smem:[#allocation25 + $0x3]] (%p3591_p1), %s2688_s22  ;;  %s2690_s4 = smov 131072  }
 0x37b   : > { %s1504_s27 = scalar_lea.hbm %s3593_s17, %s3304_s6  ;;  %2120 = sst [smem:[#allocation25 + $0x4]] (%p3591_p1), %s2688_s22 }
 0x37c   : > { %2121 = sst [smem:[#allocation25 + $0x5]] (%p3591_p1), %s2689_s12  ;;  %s2691_s21 = smov 0  }
 0x37d   : > { %2122 = dma.general (%p3591_p1), %s1516_s15, 1024, %s1504_s27, %s1410_s20, %s2690_s4, [#allocation25], %s2691_s21, 0  }
 0x37e   : > { %s3594_s13 = sld [smem:[#allocation62_spill]]  ;;  %s1556_s17 = sshll.u32 %s3257_s10, 4  ;;  %s1557_s17 = int_to_ptr.vmem [resolvable:$true] %s1556_s17 }
 0x37f   : > { %s2692_s18 = smov 256   ;;  %s2693_s20 = smov 512  }
 0x380   : > { %2123 = sst [smem:[#allocation27]] (%p3591_p1), %s2692_s18  ;;  %s2694_s27 = smov 2  }
 0x381   : > { %2124 = sst [smem:[#allocation27 + $0x1]] (%p3591_p1), %s2693_s20  ;;  %s2695_s15 = smov 128  }
 0x382   : > { %2125 = sst [smem:[#allocation27 + $0x2]] (%p3591_p1), %s2694_s27  ;;  %s2696_s7 = smov 8  }
 0x383   : > { %2126 = sst [smem:[#allocation27 + $0x3]] (%p3591_p1), %s2695_s15  ;;  %s2698_s10 = smov 0  }
 0x384   : > { %s1545_s3 = scalar_lea.hbm %s3594_s13, %s3304_s6  ;;  %2127 = sst [smem:[#allocation27 + $0x4]] (%p3591_p1), %s2695_s15 }
 0x385   : > { %2128 = sst [smem:[#allocation27 + $0x5]] (%p3591_p1), %s2696_s7  ;;  %s2697_s6 = smov 131072  }
 0x386   : > { %2129 = dma.general (%p3591_p1), %s1557_s17, 1024, %s1545_s3, %s1420_s24, %s2697_s6, [#allocation27], %s2698_s10, 0  }
 0x387   : > { %s3595_s12 = sld [smem:[#allocation63_spill]]  ;;  %s1588_s21 = sshll.u32 %s3163_s1, 4  ;;  %s3375_s21 = int_to_ptr.vmem [resolvable:$true] %s1588_s21 }
 0x388   : > { %s3596_s13 = sld [smem:[#allocation64_spill]]  ;;  %s2494_s3 = scalar_lea.vmem %s3375_s21, 512 }
 0x389   : > { %p2495_p8 = scmp.ne.s32.totalorder %s3375_s21, %s2494_s3  ;;  %s2699_s17 = smov [#allocation19]  }
 0x38a   : > { %s2498_s20 = sshll.u32 %s2699_s17, 4  ;;  %s2499_s20 = int_to_ptr.vmem [resolvable:$false] %s2498_s20 }
 0x38b   : > { %p2496_p3 = pnand %p2495_p8, %p3591_p1  ;;  %s2500_s27 = scalar_lea.vmem %s2499_s20, 1024 }
 0x38c   : > { %p2501_p5 = scmp.lt.s32.totalorder %s3375_s21, %s2499_s20  ;;  %p2502_p6 = scmp.lt.s32.totalorder %s2500_s27, %s2494_s3 }
 0x38d   : > { %s3372_s4 = scalar_lea.hbm %s3595_s12, %s3210_s28  ;;  %p2497_p9 = pneg %p2496_p3 }
 0x38e   : > { %s3381_s18 = scalar_lea.hbm %s3596_s13, %s3210_s28  ;;  %p2503_p0 = por %p2502_p6, %p2501_p5 }
 0x390   : > { %p2504_p13 = pnand %p2503_p0, %p2497_p9 }
 0x392   : > { %2507 = shalt.err (!%p2504_p13)
}
 0x393   : > { %s2508_s1 = scalar_lea.hbm %s3372_s4, 512  ;;  %s2512_s7 = scalar_lea.hbm %s3595_s12, 2048 }
 0x394   : > { %p2509_p10 = scmp.ne.s32.totalorder %s3372_s4, %s2508_s1  ;;  %p2513_p2 = scmp.lt.s32.totalorder %s3372_s4, %s3595_s12 }
 0x395   : > { %p2514_p11 = scmp.lt.s32.totalorder %s2512_s7, %s2508_s1 }
 0x396   : > { %p2510_p4 = pnand %p2509_p10, %p3591_p1 }
 0x397   : > { %p2515_p12 = por %p2514_p11, %p2513_p2 }
 0x398   : > { %p2511_p7 = pneg %p2510_p4 }
 0x39a   : > { %p2516_p8 = pnand %p2515_p12, %p2511_p7 }
 0x39c   : > { %2519 = shalt.err (!%p2516_p8)
}
 0x39d   : > { %s3597_s9 = smov 16   ;;  %s3598_s22 = smov 256  }
 0x39e   : > { %2130 = dma.vmem_to_hbm [thread:$0]  (%p3591_p1), %s3375_s21, 512, %s3372_s4, %s1420_s24, %s3598_s22, %s3598_s22, %s3597_s9  }
 0x39f   : > { %s1607_s2 = sshll.u32 %s3253_s19, 4  ;;  %s2700_s3 = smov [#allocation20]   ;;  %s1608_s2 = int_to_ptr.vmem [resolvable:$true] %s1607_s2 }
 0x3a0   : > { %s2520_s11 = scalar_lea.vmem %s1608_s2, 512  ;;  %s2524_s17 = sshll.u32 %s2700_s3, 4  ;;  %s2525_s17 = int_to_ptr.vmem [resolvable:$false] %s2524_s17 }
 0x3a1   : > { %p2521_p3 = scmp.ne.s32.totalorder %s1608_s2, %s2520_s11  ;;  %s2526_s20 = scalar_lea.vmem %s2525_s17, 1024 }
 0x3a2   : > { %p2527_p6 = scmp.lt.s32.totalorder %s1608_s2, %s2525_s17  ;;  %p2528_p0 = scmp.lt.s32.totalorder %s2526_s20, %s2520_s11 }
 0x3a3   : > { %p2522_p9 = pnand %p2521_p3, %p3591_p1 }
 0x3a4   : > { %p2529_p13 = por %p2528_p0, %p2527_p6 }
 0x3a5   : > { %p2523_p5 = pneg %p2522_p9 }
 0x3a7   : > { %p2530_p10 = pnand %p2529_p13, %p2523_p5 }
 0x3a9   : > { %2533 = shalt.err (!%p2530_p10)
}
 0x3aa   : > { %s2534_s14 = scalar_lea.hbm %s3381_s18, 512  ;;  %s2538_s4 = scalar_lea.hbm %s3596_s13, 2048 }
 0x3ab   : > { %p2535_p4 = scmp.ne.s32.totalorder %s3381_s18, %s2534_s14  ;;  %p2539_p11 = scmp.lt.s32.totalorder %s3381_s18, %s3596_s13 }
 0x3ac   : > { %p2540_p12 = scmp.lt.s32.totalorder %s2538_s4, %s2534_s14 }
 0x3ad   : > { %p2536_p7 = pnand %p2535_p4, %p3591_p1 }
 0x3ae   : > { %p2541_p8 = por %p2540_p12, %p2539_p11 }
 0x3af   : > { %p2537_p2 = pneg %p2536_p7 }
 0x3b1   : > { %p2542_p3 = pnand %p2541_p8, %p2537_p2 }
 0x3b3   : > { %2545 = shalt.err (!%p2542_p3)
}
 0x3b4   : > { %s3599_s1 = scalar_lea.sflag [#allocation21], %s3049_s23 }
 0x3b5   : > { %2131 = dma.vmem_to_hbm [thread:$0]  (%p3591_p1), %s1608_s2, 512, %s3381_s18, %s3599_s1, %s3598_s22, %s3598_s22, %s3597_s9  }
 0x3b6 PF: > { %s3600_s28 = sld [smem:[#allocation38_spill]]  ;;  %p2184_p9 = scmp.ge.s32.totalorder %s2664_s0, 2 }
 0x3b7   : > { %s3601_s15 = sld [smem:[#allocation43_spill]] }
 0x3bc   : > { %s1622_s7 = sand.u32 1, %s3600_s28  }
 0x3bd   : > { %p3602_p5 = scmp.ne.s32.totalorder %s3601_s15, 0  ;;  %s1623_s6 = scalar_lea.sflag [#allocation4], %s1622_s7 }
 0x3bf   : > { %p2159_p6 = pnand %p2184_p9, %p3602_p5 }
 0x3c1   : > { %p2160_p0 = pneg %p2159_p6 }
 0x3c3   : > { %2607 = dma.done.wait (%p2160_p0), %s1623_s6, 512  }
 0x3c4   : > { %2609 = vsyncadd (%p2160_p0), %s1623_s6, 4294966784  ;;  %s3603_s8 = sadd.s32 4294967294, %s2664_s0  }
 0x3c5   : > { %s1631_s10 = sand.u32 1, %s3603_s8  }
 0x3c6   : > { %s1632_s11 = scalar_lea.sflag [#allocation15], %s1631_s10 }
 0x3c7   : > { %2611 = dma.done.wait (%p2160_p0), %s1632_s11, 2048  }
 0x3c8   : > { %2613 = vsyncadd (%p2160_p0), %s1632_s11, 4294965248  ;;  %s1650_s23 = scalar_lea.sflag [#allocation18], %s1631_s10 }
 0x3c9   : > { %2615 = dma.done.wait (%p2160_p0), %s1650_s23, 1536  }
 0x3ca   : > { %2617 = vsyncadd (%p2160_p0), %s1650_s23, 4294965760  ;;  %s1668_s18 = scalar_lea.sflag [#allocation21], %s1622_s7 }
 0x3cb   : > { %2619 = dma.done.wait (%p2160_p0), %s1668_s18, 512  }
 0x3cc   : > { %2621 = vsyncadd (%p2160_p0), %s1668_s18, 4294966784  ;;  %s47_s0 = sadd.s32 1, %s2664_s0   ;;  %s3604_s21 = sld [smem:[#allocation36_spill]] }
 0x3cd   : > { %p44_p1 = scmp.ge.s32.totalorder %s47_s0, 6   ;;  %s3605_s22 = sld [smem:[#allocation37_spill]] }
 0x3ce   : > { %s3606_s23 = sld [smem:[#allocation45_spill]]  ;;  %s3609_s24 = smov %s2640_s25 }
 0x3cf   : > { %s3607_s9 = sld [smem:[#allocation44_spill]]  ;;  %s3610_s25 = smov %s2644_s26 }
 0x3d0   : > { %s3608_s2 = sld [smem:[#allocation47_spill]]  ;;  %s3611_s26 = smov %s3006_s5 }
 0x3d1   : > { %s3612_s27 = smov %s2656_s29  ;;  %s3613_s28 = smov %s2660_s30 }
 0x3d2   :  { %46 = sbr.rel (!%p44_p1) target bundleno = 37 (0x25), region = 250 }
 0x3d5   : > { %s3614_s29 = smov %s3607_s9 }
 0x3d6   : > { %s3615_s30 = smov %s3608_s2 }
 0x3d7   :  { %1673 = vsyncpa [#allocation3], 1 }
 0x3d8   :  { %1675 = vsyncpa [#allocation3 + $0x1], 1 }
 0x3d9   :  { %1676 = vsyncpa [#allocation6], 1 }
 0x3da   :  { %1678 = vsyncpa [#allocation6 + $0x1], 1 }
 0x3db   :  { %1679 = vsyncpa [#allocation9], 1 }
 0x3dc   :  { %1680 = vsyncpa [#allocation12], 1 }
 0x3dd   :  { %1681 = vsyncpa [#allocation4], 1 }
 0x3de   :  { %1683 = vsyncpa [#allocation4 + $0x1], 1 }
 0x3df   :  { %1684 = vsyncpa [#allocation15], 1 }
 0x3e0   :  { %1686 = vsyncpa [#allocation15 + $0x1], 1 }
 0x3e1   :  { %1687 = vsyncpa [#allocation18], 1 }
 0x3e2   :  { %1689 = vsyncpa [#allocation18 + $0x1], 1 }
 0x3e3   :  { %1690 = vsyncpa [#allocation21], 1 }
 0x3e4   :  { %1692 = vsyncpa [#allocation21 + $0x1], 1 }

</bundles_post_ra>
